<compile_context>
chip_gen: v7x
topology: tpu7x:2x2x1
jax: 0.10.0
libtpu: 0.0.40
codegen_flags: <defaults>
</compile_context>

<pallas_src>
import jax
import jax.numpy as jnp
from jax.experimental import pallas as pl
from jax.experimental.pallas import tpu as pltpu


def _wrapper_model_kernel(x_ref, k_ref, w1_ref, b1_ref, w2_ref, b2_ref, o_ref):
    # x/k arrive bf16; gate in f32 on the VPU/EUP (v5e has no bf16 VPU/EUP).
    x = x_ref[...].astype(jnp.float32)
    k = k_ref[...].astype(jnp.float32)
    gated = (x * jax.nn.sigmoid(k)).astype(w1_ref.dtype)  # bf16 for the MXU

    # First matmul + bias + relu (MXU, f32 accumulate).
    h = jnp.dot(gated, w1_ref[...], preferred_element_type=jnp.float32)
    h = jnp.maximum(h + b1_ref[...], 0.0)

    # Second matmul + bias (bf16 LHS halves second-dot operand bytes).
    h = h.astype(w2_ref.dtype)
    y = jnp.dot(h, w2_ref[...], preferred_element_type=jnp.float32)
    o_ref[...] = (y + b2_ref[...]).astype(o_ref.dtype)


def _round_up(x, m):
    return ((x + m - 1) // m) * m


def _auto_tile_m(B):
    # Large tiles amortize the ~0.35 us per-grid-step overhead and lift DMA
    # efficiency; >=2 even steps keep both v7x TensorCores busy (harmless one
    # extra step on single-TC v5e/v6e).
    if B < 256:
        return B  # single tile equal to the full dim (layout-legal for any B)
    half = _round_up((B + 1) // 2, 8)
    return min(512, half)


def wrapper_model_forward(x, k, w1, b1, w2, b2, *, tile_m=None, out_dtype=jnp.float32):
    """Pallas equivalent of WrapperModel.forward(x, k) with the synthetic inner model.

    x, k: [B, D_in] (bf16 preferred; streamed bf16 either way).
    w1: [D_in, D_hid], w2: [D_hid, D_out] (pre-cast to bf16 by the caller when
    possible).  b1: [1, D_hid], b2: [1, D_out] f32.  Returns [B, D_out] out_dtype.
    """
    B, D_in = x.shape
    D_hid = w1.shape[1]
    D_out = w2.shape[1]
    assert k.shape == (B, D_in)
    assert w1.shape == (D_in, D_hid) and w2.shape == (D_hid, D_out)
    assert b1.shape == (1, D_hid) and b2.shape == (1, D_out)

    # Activations stream bf16 (no-op if the caller already stores them bf16,
    # which is the recommended path for this BW-bound kernel).
    if x.dtype != jnp.bfloat16:
        x = x.astype(jnp.bfloat16)
    if k.dtype != jnp.bfloat16:
        k = k.astype(jnp.bfloat16)
    # Weights should be pre-cast to bf16 once outside the hot path; defensive
    # cast only if the caller didn't.
    if w1.dtype != jnp.bfloat16:
        w1 = w1.astype(jnp.bfloat16)
    if w2.dtype != jnp.bfloat16:
        w2 = w2.astype(jnp.bfloat16)
    b1 = b1.astype(jnp.float32)
    b2 = b2.astype(jnp.float32)

    # Batch/M tiling — no padding; Pallas masks the ragged last block.
    tm = _auto_tile_m(B) if tile_m is None else min(tile_m, B)
    assert tm == B or tm % 8 == 0, "tile_m must be a multiple of 8 (or equal B)"
    grid_m = pl.cdiv(B, tm)

    out_itemsize = jnp.dtype(out_dtype).itemsize

    # VMEM budget from actual shapes: single-buffered resident weights/biases +
    # double-buffered x/k/out tiles, 1.5x + 4 MiB headroom, capped for v7x.
    bytes_weights = (D_in * D_hid + D_hid * D_out) * 2 + (D_hid + D_out) * 4
    bytes_tiles = 2 * (2 * tm * D_in * 2 + tm * D_out * out_itemsize)
    vmem_limit = int(min(56 << 20, max(16 << 20,
                                       int(1.5 * (bytes_weights + bytes_tiles)) + (4 << 20))))

    cost = pl.CostEstimate(
        flops=2 * B * (D_in * D_hid + D_hid * D_out),
        transcendentals=B * D_in,  # sigmoid
        bytes_accessed=(
            2 * B * D_in * 2                          # x, k (bf16)
            + (D_in * D_hid + D_hid * D_out) * 2      # bf16 weights
            + (D_hid + D_out) * 4                     # biases
            + B * D_out * out_itemsize                # output
        ),
    )

    out = pl.pallas_call(
        _wrapper_model_kernel,
        out_shape=jax.ShapeDtypeStruct((B, D_out), out_dtype),
        grid=(grid_m,),
        in_specs=[
            pl.BlockSpec((tm, D_in), lambda i: (i, 0)),   # x: streamed over M
            pl.BlockSpec((tm, D_in), lambda i: (i, 0)),   # k: streamed over M
            # Constant index_map => VMEM-resident, single buffer is enough.
            pl.BlockSpec((D_in, D_hid), lambda i: (0, 0),
                         pipeline_mode=pl.Buffered(1)),   # W1
            pl.BlockSpec((1, D_hid), lambda i: (0, 0),
                         pipeline_mode=pl.Buffered(1)),   # b1
            pl.BlockSpec((D_hid, D_out), lambda i: (0, 0),
                         pipeline_mode=pl.Buffered(1)),   # W2
            pl.BlockSpec((1, D_out), lambda i: (0, 0),
                         pipeline_mode=pl.Buffered(1)),   # b2
        ],
        out_specs=pl.BlockSpec((tm, D_out), lambda i: (i, 0)),
        compiler_params=pltpu.CompilerParams(
            # M axis is independent -> shard across v7x's 2 TCs; harmless on 1-TC chips.
            dimension_semantics=("parallel",),
            vmem_limit_bytes=vmem_limit,
        ),
        cost_estimate=cost,
    )(x, k, w1, b1, w2, b2)

    return out


def _reference(x, k, w1, b1, w2, b2):
    # Reference with the same bf16-operand / f32-gate / f32-accumulate arithmetic.
    xf = x.astype(jnp.float32)
    kf = k.astype(jnp.float32)
    gated = (xf * jax.nn.sigmoid(kf)).astype(jnp.bfloat16)
    h = jnp.dot(gated, w1.astype(jnp.bfloat16), preferred_element_type=jnp.float32) + b1
    h = jnp.maximum(h, 0.0).astype(jnp.bfloat16)
    return jnp.dot(h, w2.astype(jnp.bfloat16), preferred_element_type=jnp.float32) + b2


if __name__ == "__main__":
    # Small but MXU-meaningful shapes; auto tile -> grid=(2,), exercising the
    # DMA pipeline and the v7x 2-TC split.
    B, D_IN, D_HID, D_OUT = 256, 256, 256, 256

    key = jax.random.PRNGKey(0)
    kx, kk, kw1, kb1, kw2, kb2 = jax.random.split(key, 6)

    # Activations stored/streamed in bf16 (kernel is HBM-BW bound).
    x = jax.random.normal(kx, (B, D_IN), dtype=jnp.float32).astype(jnp.bfloat16)
    kin = jax.random.normal(kk, (B, D_IN), dtype=jnp.float32).astype(jnp.bfloat16)

    # Deterministic synthetic inner-model params; weights pre-cast to bf16 ONCE
    # here (hoisted out of the per-call path), biases stay f32.
    w1 = (jax.random.normal(kw1, (D_IN, D_HID), dtype=jnp.float32) * 0.05).astype(jnp.bfloat16)
    b1 = jax.random.normal(kb1, (1, D_HID), dtype=jnp.float32) * 0.01
    w2 = (jax.random.normal(kw2, (D_HID, D_OUT), dtype=jnp.float32) * 0.05).astype(jnp.bfloat16)
    b2 = jax.random.normal(kb2, (1, D_OUT), dtype=jnp.float32) * 0.01

    out = wrapper_model_forward(x, kin, w1, b1, w2, b2)
    out = jax.block_until_ready(out)

    ref = _reference(x, kin, w1, b1, w2, b2)
    assert out.shape == (B, D_OUT)
    assert out.dtype == jnp.float32
    assert jnp.allclose(out, ref, atol=1e-2, rtol=1e-2), "mismatch vs reference"

    print("KERNEL_OK")
</pallas_src>

<mosaic_0001>
module attributes {stable_mosaic.version = 11 : i64} {
  func.func @_wrapper_model_kernel(%arg0: i32, %arg1: memref<128x256xbf16, #tpu.memory_space<vmem>>, %arg2: memref<128x256xbf16, #tpu.memory_space<vmem>>, %arg3: memref<256x256xbf16, #tpu.memory_space<vmem>>, %arg4: memref<1x256xf32, #tpu.memory_space<vmem>>, %arg5: memref<256x256xbf16, #tpu.memory_space<vmem>>, %arg6: memref<1x256xf32, #tpu.memory_space<vmem>>, %arg7: memref<128x256xf32, #tpu.memory_space<vmem>>) attributes {dimension_semantics = [#tpu.dimension_semantics<parallel>], iteration_bounds = array<i64: 2>, scalar_prefetch = 0 : i64, scratch_operands = 0 : i64, tpu.core_type = #tpu.core_type<tc>, window_params = [{transform_indices = @transform_0, window_bounds = array<i64: 128, 256>}, {transform_indices = @transform_1, window_bounds = array<i64: 128, 256>}, {pipeline_mode = #tpu.pipeline_mode<synchronous>, transform_indices = @transform_2, window_bounds = array<i64: 256, 256>}, {pipeline_mode = #tpu.pipeline_mode<synchronous>, transform_indices = @transform_3, window_bounds = array<i64: 1, 256>}, {pipeline_mode = #tpu.pipeline_mode<synchronous>, transform_indices = @transform_4, window_bounds = array<i64: 256, 256>}, {pipeline_mode = #tpu.pipeline_mode<synchronous>, transform_indices = @transform_5, window_bounds = array<i64: 1, 256>}, {transform_indices = @transform_6, window_bounds = array<i64: 128, 256>}]} {
    %c0 = arith.constant 0 : index
    %c0_0 = arith.constant 0 : index
    %0 = vector.load %arg1[%c0, %c0_0] : memref<128x256xbf16, #tpu.memory_space<vmem>>, vector<128x256xbf16>
    %1 = arith.extf %0 : vector<128x256xbf16> to vector<128x256xf32>
    %c0_1 = arith.constant 0 : index
    %c0_2 = arith.constant 0 : index
    %2 = vector.load %arg2[%c0_1, %c0_2] : memref<128x256xbf16, #tpu.memory_space<vmem>>, vector<128x256xbf16>
    %3 = arith.extf %2 : vector<128x256xbf16> to vector<128x256xf32>
    %4 = arith.negf %3 : vector<128x256xf32>
    %5 = math.exp %4 : vector<128x256xf32>
    %cst = arith.constant 1.000000e+00 : f32
    %6 = vector.broadcast %cst : f32 to vector<128x256xf32>
    %7 = arith.addf %6, %5 : vector<128x256xf32>
    %8 = arith.divf %6, %7 : vector<128x256xf32>
    %9 = arith.mulf %1, %8 : vector<128x256xf32>
    %10 = arith.truncf %9 : vector<128x256xf32> to vector<128x256xbf16>
    %c0_3 = arith.constant 0 : index
    %c0_4 = arith.constant 0 : index
    %11 = vector.load %arg3[%c0_3, %c0_4] : memref<256x256xbf16, #tpu.memory_space<vmem>>, vector<256x256xbf16>
    %cst_5 = arith.constant dense<0.000000e+00> : vector<128x256xf32>
    %12 = tpu.matmul %10, %11, %cst_5 {dimension_numbers = #tpu.dot_dimension_numbers<[1], [0], [0], [1], [0, 0, 1, 1], [], []>} : vector<128x256xbf16>, vector<256x256xbf16>, vector<128x256xf32> -> vector<128x256xf32>
    %c0_6 = arith.constant 0 : index
    %c0_7 = arith.constant 0 : index
    %13 = vector.load %arg4[%c0_6, %c0_7] : memref<1x256xf32, #tpu.memory_space<vmem>>, vector<1x256xf32>
    %14 = vector.broadcast %13 : vector<1x256xf32> to vector<128x256xf32>
    %15 = arith.addf %12, %14 : vector<128x256xf32>
    %cst_8 = arith.constant 0.000000e+00 : f32
    %16 = vector.broadcast %cst_8 : f32 to vector<128x256xf32>
    %17 = arith.maximumf %15, %16 : vector<128x256xf32>
    %18 = arith.truncf %17 : vector<128x256xf32> to vector<128x256xbf16>
    %c0_9 = arith.constant 0 : index
    %c0_10 = arith.constant 0 : index
    %19 = vector.load %arg5[%c0_9, %c0_10] : memref<256x256xbf16, #tpu.memory_space<vmem>>, vector<256x256xbf16>
    %cst_11 = arith.constant dense<0.000000e+00> : vector<128x256xf32>
    %20 = tpu.matmul %18, %19, %cst_11 {dimension_numbers = #tpu.dot_dimension_numbers<[1], [0], [0], [1], [0, 0, 1, 1], [], []>} : vector<128x256xbf16>, vector<256x256xbf16>, vector<128x256xf32> -> vector<128x256xf32>
    %c0_12 = arith.constant 0 : index
    %c0_13 = arith.constant 0 : index
    %21 = vector.load %arg6[%c0_12, %c0_13] : memref<1x256xf32, #tpu.memory_space<vmem>>, vector<1x256xf32>
    %22 = vector.broadcast %21 : vector<1x256xf32> to vector<128x256xf32>
    %23 = arith.addf %20, %22 : vector<128x256xf32>
    %c0_14 = arith.constant 0 : index
    %c0_15 = arith.constant 0 : index
    %24 = vector.load %arg7[%c0_14, %c0_15] : memref<128x256xf32, #tpu.memory_space<vmem>>, vector<128x256xf32>
    tpu.vector_store %arg7[%c0_14, %c0_15], %23 {strides = array<i32>} : memref<128x256xf32, #tpu.memory_space<vmem>>, vector<128x256xf32>,
    return
  }
  func.func @transform_0(%arg0: i32) -> (i32, i32) {
    %c0_i32 = arith.constant 0 : i32
    %c0_i32_0 = arith.constant 0 : i32
    return %arg0, %c0_i32 : i32, i32
  }
  func.func @transform_1(%arg0: i32) -> (i32, i32) {
    %c0_i32 = arith.constant 0 : i32
    %c0_i32_0 = arith.constant 0 : i32
    return %arg0, %c0_i32 : i32, i32
  }
  func.func @transform_2(%arg0: i32) -> (i32, i32) {
    %c0_i32 = arith.constant 0 : i32
    %c0_i32_0 = arith.constant 0 : i32
    %c0_i32_1 = arith.constant 0 : i32
    return %c0_i32, %c0_i32_0 : i32, i32
  }
  func.func @transform_3(%arg0: i32) -> (i32, i32) {
    %c0_i32 = arith.constant 0 : i32
    %c0_i32_0 = arith.constant 0 : i32
    %c0_i32_1 = arith.constant 0 : i32
    return %c0_i32, %c0_i32_0 : i32, i32
  }
  func.func @transform_4(%arg0: i32) -> (i32, i32) {
    %c0_i32 = arith.constant 0 : i32
    %c0_i32_0 = arith.constant 0 : i32
    %c0_i32_1 = arith.constant 0 : i32
    return %c0_i32, %c0_i32_0 : i32, i32
  }
  func.func @transform_5(%arg0: i32) -> (i32, i32) {
    %c0_i32 = arith.constant 0 : i32
    %c0_i32_0 = arith.constant 0 : i32
    %c0_i32_1 = arith.constant 0 : i32
    return %c0_i32, %c0_i32_0 : i32, i32
  }
  func.func @transform_6(%arg0: i32) -> (i32, i32) {
    %c0_i32 = arith.constant 0 : i32
    %c0_i32_0 = arith.constant 0 : i32
    return %arg0, %c0_i32 : i32, i32
  }
}

</mosaic_0001>

<bundles_post_ra>
// kernel: tpu_custom_call.1
= control target key start
LH: loop header
LB: loop body
LE: loop exit
PB: predicated region body
PF: predicated region fallthrough
CT: control target
= control target key end

     0   :  { %s2726_s0 = inlined_call_operand.hbm [shape: bf16[256,256], index: 0, kind: input, shape index: {}]   ;;  %s2727_s1 = inlined_call_operand.hbm [shape: bf16[256,256], index: 1, kind: input, shape index: {}]   ;;  %s2728_s2 = inlined_call_operand.hbm [shape: bf16[256,256], index: 2, kind: input, shape index: {}]   ;;  %s2729_s3 = inlined_call_operand.vmem [shape: f32[1,256], index: 3, kind: input, shape index: {}]   ;;  %s2730_s4 = inlined_call_operand.hbm [shape: bf16[256,256], index: 4, kind: input, shape index: {}]   ;;  %s2731_s5 = inlined_call_operand.vmem [shape: f32[1,256], index: 5, kind: input, shape index: {}]   ;;  %s2732_s6 = inlined_call_operand.hbm [shape: f32[256,256], index: 6, kind: output, shape index: {}]  }
   0x1   :  { %2740 = sst [smem:[#allocation16_spill]] %s2726_s0 }
   0x2   :  { %2741 = sst [smem:[#allocation17_spill]] %s2728_s2 }
   0x3   :  { %2742 = sst [smem:[#allocation18_spill]] %s2730_s4 }
   0x4   :  { %11 = vsyncpa [#allocation3], 0 }
   0x5   :  { %13 = vsyncpa [#allocation3 + $0x1], 0 }
   0x6   :  { %14 = vsyncpa [#allocation6], 0 }
   0x7   :  { %16 = vsyncpa [#allocation6 + $0x1], 0 }
   0x8   :  { %17 = vsyncpa [#allocation9], 0 }
   0x9   :  { %18 = vsyncpa [#allocation4], 0 }
   0xa   :  { %20 = vsyncpa [#allocation4 + $0x1], 0  ;;  %s2191_s21 = smov 0   ;;  %s2193_s22 = smov 0  }
   0xb   :  { %s2195_s23 = smov 0   ;;  %s2197_s24 = smov 0  }
   0xc LB: > { %s2212_s25 = sadd.s32 4294967295, %s2145_s24   ;;  %s1524_s26 = sadd.s32 4294967294, %s2145_s24   ;;  %s2145_s24 = sphi %s2197_s24, %s2766_s24   ;;  %s2141_s23 = sphi %s2195_s23, %s2765_s23   ;;  %s2137_s22 = sphi %s2193_s22, %s2764_s22   ;;  %s2133_s21 = sphi %s2191_s21, %s2763_s21  }
   0xd   : > { %p46_p0 = scmp.ne.s32.totalorder %s2137_s22, %s2133_s21  ;;  %p2733_p1 = scmp.eq.s32.totalorder %s2212_s25, 0 }
   0xe   : > { %p186_p3 = scmp.eq.s32.totalorder %s1524_s26, 1  ;;  %p1525_p5 = scmp.ge.s32.totalorder %s2145_s24, 1 }
   0xf   : > { %p2221_p4 = por %p2733_p1, %p46_p0  ;;  %p193_p7 = scmp.lt.s32.totalorder %s2145_s24, 3 }
  0x10   : > { %p2226_p6 = por %p186_p3, %p46_p0  ;;  %s2147_s30 = smov [#allocation7]  }
  0x11   : > { %s2743_s27 = scalar_select %p2221_p4, 1, 0 }
  0x12   : > { %s2744_s28 = scalar_select %p2226_p6, 1, 0 }
  0x13   : > { %p2231_p8 = pnand %p1525_p5, %p193_p7  ;;  %s205_s7 = sshll.u32 %s2147_s30, 4  ;;  %s2235_s7 = int_to_ptr.vmem [resolvable:$true] %s205_s7 }
  0x14   : > { %s2148_s9 = smov [#allocation8]   ;;  %s2747_s2 = sld [smem:[#allocation17_spill]] }
  0x15   : > { %p1665_p9 = pneg %p2231_p8  ;;  %s221_s10 = sshll.u32 %s2148_s9, 4  ;;  %s2246_s10 = int_to_ptr.vmem [resolvable:$true] %s221_s10 }
  0x17   : > { %p2242_p11 = pnand %p1665_p9, %p2733_p1 }
  0x19   : > { %p1953_p13 = pneg %p2242_p11 }
  0x1a   : > { %s1951_s13 = scalar_lea.hbm %s2747_s2, 4096 }
  0x1b   : > { %p1952_p12 = scmp.ne.s32.totalorder %s2747_s2, %s1951_s13  ;;  %p1958_p5 = scmp.lt.u32.totalorder %s1951_s13, %s2747_s2 }
  0x1d   : > { %p1954_p0 = pnand %p1953_p13, %p1952_p12 }
  0x1f   : > { %p1955_p3 = pneg %p1954_p0 }
  0x21   : > { %p1960_p7 = pnand %p1958_p5, %p1955_p3 }
  0x23   : > { %1963 = shalt.err (!%p1960_p7)
}
  0x24   : > { %s1964_s18 = scalar_lea.vmem %s2235_s7, 4096  ;;  %p1972_p2 = scmp.lt.s32.totalorder %s2235_s7, %s2235_s7 }
  0x25   : > { %p1965_p9 = scmp.ne.s32.totalorder %s2235_s7, %s1964_s18  ;;  %p1973_p12 = scmp.lt.s32.totalorder %s1964_s18, %s1964_s18 }
  0x27   : > { %p1967_p10 = pnand %p1965_p9, %p1953_p13  ;;  %p1974_p0 = por %p1973_p12, %p1972_p2 }
  0x29   : > { %p1968_p1 = pneg %p1967_p10 }
  0x2b   : > { %p1975_p6 = pnand %p1974_p0, %p1968_p1 }
  0x2d   : > { %1978 = shalt.err (!%p1975_p6)
}
  0x2e   : > { %s2734_s19 = smov 128   ;;  %s2736_s20 = smov 8  }
  0x2f   : > { %1668 = dma.hbm_to_vmem [thread:$0]  (!%p2242_p11), %s2747_s2, 4096, %s2235_s7, [#allocation6], %s2734_s19, %s2734_s19, %s2736_s20  }
  0x30   : > { %s2748_s4 = sld [smem:[#allocation18_spill]] }
  0x36   : > { %s1979_s12 = scalar_lea.hbm %s2748_s4, 4096 }
  0x37   : > { %p1980_p1 = scmp.ne.s32.totalorder %s2748_s4, %s1979_s12  ;;  %p1986_p10 = scmp.lt.u32.totalorder %s1979_s12, %s2748_s4 }
  0x39   : > { %p1982_p2 = pnand %p1980_p1, %p1953_p13 }
  0x3b   : > { %p1983_p6 = pneg %p1982_p2 }
  0x3d   : > { %p1988_p3 = pnand %p1986_p10, %p1983_p6 }
  0x3f   : > { %1991 = shalt.err (!%p1988_p3)
}
  0x40   : > { %s1992_s7 = scalar_lea.vmem %s2246_s10, 4096  ;;  %p2000_p12 = scmp.lt.s32.totalorder %s2246_s10, %s2246_s10 }
  0x41   : > { %p1993_p5 = scmp.ne.s32.totalorder %s2246_s10, %s1992_s7  ;;  %p2001_p0 = scmp.lt.s32.totalorder %s1992_s7, %s1992_s7 }
  0x43   : > { %p1995_p7 = pnand %p1993_p5, %p1953_p13  ;;  %p2002_p1 = por %p2001_p0, %p2000_p12 }
  0x45   : > { %p1996_p9 = pneg %p1995_p7 }
  0x47   : > { %p2003_p2 = pnand %p2002_p1, %p1996_p9 }
  0x49   : > { %2006 = shalt.err (!%p2003_p2)
}
  0x4a   : > { %1671 = dma.hbm_to_vmem [thread:$0]  (!%p2242_p11), %s2748_s4, 4096, %s2246_s10, [#allocation9], %s2734_s19, %s2734_s19, %s2736_s20  }
  0x4b   : > { %s2307_s8 = sadd.s32 1, %s2145_s24   ;;  %s33_s26 = sadd.s32 1, %s2141_s23 }
  0x4c   : > { %s30_s30 = ssub.s32 %s2145_s24, %s2307_s8  ;;  %p40_p13 = scmp.ne.s32.totalorder %s2141_s23, %s2137_s22 }
  0x4d   : > { %p31_p6 = scmp.eq.s32.totalorder %s30_s30, 0  ;;  %p41_p10 = scmp.eq.s32.totalorder %s2145_s24, 0 }
  0x4e   : > { %p2749_p3 = scmp.eq.s32.totalorder %s2212_s25, 1  ;;  %p1685_p7 = scmp.lt.s32.totalorder %s2145_s24, 2 }
  0x4f   : > { %s2323_s11 = scalar_select %p31_p6, %s2141_s23, %s33_s26  }
  0x50   : > { %p2317_p5 = por %p2749_p3, %p40_p13  ;;  %p42_p9 = por %p41_p10, %p40_p13 }
  0x51   : > { %s238_s12 = sand.u32 1, %s2141_s23   ;;  %s1646_s10 = sshll.u32 %s2145_s24, 11 }
  0x52   : > { %s2750_s9 = scalar_select %p2317_p5, 1, 0 }
  0x53   : > { %s1529_s13 = sshll.u32 %s238_s12, 7  ;;  %s2751_s0 = sld [smem:[#allocation16_spill]] }
  0x54   : > { %s242_s7 = scalar_lea.vmem [#allocation2], %s1529_s13  ;;  %p2334_p11 = pnand %p1685_p7, %p42_p9 }
  0x55   : > { %s250_s17 = sshll.u32 %s242_s7, 4  ;;  %s2341_s14 = scalar_lea.hbm %s2727_s1, %s1646_s10  ;;  %s2332_s17 = int_to_ptr.vmem [resolvable:$true] %s250_s17 }
  0x56   : > { %s264_s15 = scalar_lea.vmem [#allocation5], %s1529_s13  ;;  %s2345_s20 = scalar_lea.sflag [#allocation3], %s238_s12 }
  0x57   : > { %s2343_s19 = sshll.u32 %s264_s15, 4  ;;  %p2009_p0 = pneg %p2334_p11  ;;  %s2377_s19 = int_to_ptr.vmem [resolvable:$true] %s2343_s19 }
  0x59   : > { %s2330_s16 = scalar_lea.hbm %s2751_s0, %s1646_s10  ;;  %s2012_s26 = scalar_lea.hbm %s2751_s0, 4096 }
  0x5a   : > { %s2007_s7 = scalar_lea.hbm %s2330_s16, 2048  ;;  %p2013_p13 = scmp.lt.u32.totalorder %s2330_s16, %s2751_s0 }
  0x5b   : > { %p2008_p12 = scmp.ne.s32.totalorder %s2330_s16, %s2007_s7  ;;  %p2014_p6 = scmp.lt.u32.totalorder %s2012_s26, %s2007_s7 }
  0x5c   : > { %p2016_p3 = scmp.lt.u32.totalorder %s2007_s7, %s2330_s16 }
  0x5d   : > { %p2010_p1 = pnand %p2009_p0, %p2008_p12  ;;  %p2015_p10 = por %p2014_p6, %p2013_p13 }
  0x5f   : > { %p2011_p2 = pneg %p2010_p1  ;;  %p2017_p7 = por %p2016_p3, %p2015_p10 }
  0x61   : > { %p2018_p9 = pnand %p2017_p7, %p2011_p2 }
  0x63   : > { %2021 = shalt.err (!%p2018_p9)
}
  0x64   : > { %s2022_s12 = scalar_lea.vmem %s2332_s17, 2048  ;;  %s2151_s2 = smov [#allocation2]  }
  0x65   : > { %p2023_p12 = scmp.ne.s32.totalorder %s2332_s17, %s2022_s12  ;;  %s2027_s4 = sshll.u32 %s2151_s2, 4  ;;  %s2028_s4 = int_to_ptr.vmem [resolvable:$false] %s2027_s4 }
  0x66   : > { %s2029_s13 = scalar_lea.vmem %s2028_s4, 4096  ;;  %p2030_p4 = scmp.lt.s32.totalorder %s2332_s17, %s2028_s4 }
  0x67   : > { %p2025_p1 = pnand %p2023_p12, %p2009_p0  ;;  %p2031_p13 = scmp.lt.s32.totalorder %s2029_s13, %s2022_s12 }
  0x69   : > { %p2026_p5 = pneg %p2025_p1  ;;  %p2032_p6 = por %p2031_p13, %p2030_p4 }
  0x6b   : > { %p2033_p10 = pnand %p2032_p6, %p2026_p5 }
  0x6d   : > { %2036 = shalt.err (!%p2033_p10)
}
  0x6e   : > { %s2753_s15 = smov 8   ;;  %s2754_s7 = smov 128  }
  0x6f   : > { %1675 = dma.hbm_to_vmem [thread:$0]  (!%p2334_p11), %s2330_s16, 2048, %s2332_s17, %s2345_s20, %s2754_s7, %s2754_s7, %s2753_s15  }
  0x70   : > { %s260_s26 = sand.u32 1, %s2145_s24   ;;  %s2037_s10 = scalar_lea.hbm %s2341_s14, 2048 }
  0x71   : > { %s2380_s30 = scalar_lea.sflag [#allocation6], %s260_s26  ;;  %p2038_p4 = scmp.ne.s32.totalorder %s2341_s14, %s2037_s10 }
  0x72   : > { %s2042_s4 = scalar_lea.hbm %s2727_s1, 4096  ;;  %p2043_p3 = scmp.lt.u32.totalorder %s2341_s14, %s2727_s1 }
  0x73   : > { %p2040_p5 = pnand %p2038_p4, %p2009_p0  ;;  %p2044_p7 = scmp.lt.u32.totalorder %s2042_s4, %s2037_s10 }
  0x74   : > { %p2046_p12 = scmp.lt.u32.totalorder %s2037_s10, %s2341_s14 }
  0x75   : > { %p2041_p2 = pneg %p2040_p5  ;;  %p2045_p9 = por %p2044_p7, %p2043_p3 }
  0x77   : > { %p2047_p1 = por %p2046_p12, %p2045_p9 }
  0x79   : > { %p2048_p13 = pnand %p2047_p1, %p2041_p2 }
  0x7b   : > { %2051 = shalt.err (!%p2048_p13)
}
  0x7c   : > { %s2052_s20 = scalar_lea.vmem %s2377_s19, 2048  ;;  %s2152_s16 = smov [#allocation5]  }
  0x7d   : > { %p2053_p6 = scmp.ne.s32.totalorder %s2377_s19, %s2052_s20  ;;  %s2057_s17 = sshll.u32 %s2152_s16, 4  ;;  %s2058_s17 = int_to_ptr.vmem [resolvable:$false] %s2057_s17 }
  0x7e   : > { %s2059_s0 = scalar_lea.vmem %s2058_s17, 4096  ;;  %p2060_p5 = scmp.lt.s32.totalorder %s2377_s19, %s2058_s17 }
  0x7f   : > { %p2055_p10 = pnand %p2053_p6, %p2009_p0  ;;  %p2061_p3 = scmp.lt.s32.totalorder %s2059_s0, %s2052_s20 }
  0x81   : > { %p2056_p4 = pneg %p2055_p10  ;;  %p2062_p7 = por %p2061_p3, %p2060_p5 }
  0x83   : > { %p2063_p9 = pnand %p2062_p7, %p2056_p4 }
  0x85   : > { %2066 = shalt.err (!%p2063_p9)
}
  0x86   : > { %1678 = dma.hbm_to_vmem [thread:$0]  (!%p2334_p11), %s2341_s14, 2048, %s2377_s19, %s2380_s30, %s2754_s7, %s2754_s7, %s2753_s15  }
  0x87   : > { %284 = sbr.rel (%p2231_p8) target bundleno = 727 (0x2d7), region = 44  ;;  %s2412_s26 = sand.u32 (!%p2231_p8), 1, %s2137_s22  }
  0x88   : > { %s1538_s10 = sshll.u32 (!%p2231_p8), %s2412_s26, 7  ;;  %s287_s12 = scalar_lea.sflag (!%p2231_p8), [#allocation3], %s2412_s26 }
  0x89   : > { %s2416_s2 = scalar_lea.vmem (!%p2231_p8), [#allocation2], %s1538_s10  ;;  %p2755_p0 = scmp.ne.s32.totalorder (!%p2231_p8), %s2743_s27, 0 }
  0x8e   : > { %2112 = dma.done.wait (%p2755_p0), %s287_s12, 2048  }
  0x8f   : > { %2114 = vsyncadd (%p2755_p0), %s287_s12, 4294965248  ;;  %s295_s19 = sand.u32 1, %s2212_s25   ;;  %s2423_s18 = scalar_lea.vmem [#allocation5], %s1538_s10 }
  0x90   : > { %s296_s29 = scalar_lea.sflag [#allocation6], %s295_s19 }
  0x91   : > { %2116 = dma.done.wait (%p2755_p0), %s296_s29, 2048  }
  0x92   : > { %2118 = vsyncadd (%p2755_p0), %s296_s29, 4294965248  ;;  %p2756_p8 = scmp.eq.s32.totalorder %s2212_s25, 0 }
  0x94   : > { %2120 = dma.done.wait (%p2756_p8), [#allocation6], 4096   ;;  %p2757_p11 = pmov %p2756_p8 }
  0x95   : > { %p2758_p2 = pmov %p2756_p8 }
  0x96   : > { %2122 = vsyncadd (%p2757_p11), [#allocation6], 4294963200 }
  0x97   : > { %2124 = dma.done.wait (%p2758_p2), [#allocation9], 4096   ;;  %p2759_p12 = pmov %p2758_p2 }
  0x98   : > { %v1727_v0 = vld [vmem:[#allocation7 + $0x4] ss:$8 sps:$4 sm:$0xff]   ;;  %v1729_v1 = vld [vmem:[#allocation7] ss:$8 sps:$4 sm:$0xff]   ;;  %v1730_v2 = vld [vmem:[#allocation7 + $0x14] ss:$8 sps:$4 sm:$0xff]  }
  0x99   : > { %2126 = vsyncadd (%p2759_p12), [#allocation9], 4294963200  ;;  %884 = vmatprep.subr.bf16.mxu0 %v1727_v0  ;;  %v1732_v3 = vld [vmem:[#allocation7 + $0x10] ss:$8 sps:$4 sm:$0xff]   ;;  %v1733_v4 = vld [vmem:[#allocation7 + $0x24] ss:$8 sps:$4 sm:$0xff]  }
  0x9a   : > { %885 = vmatpush1.bf16.msra.mxu0 %v1729_v1  ;;  %v1735_v5 = vld [vmem:[#allocation7 + $0x20] ss:$8 sps:$4 sm:$0xff]   ;;  %v1736_v6 = vld [vmem:[#allocation7 + $0x34] ss:$8 sps:$4 sm:$0xff]   ;;  %v1738_v7 = vld [vmem:[#allocation7 + $0x30] ss:$8 sps:$4 sm:$0xff]  }
  0x9b   : > { %886 = vmatprep.subr.bf16.mxu0 %v1730_v2  ;;  %v1739_v8 = vld [vmem:[#allocation7 + $0x44] ss:$8 sps:$4 sm:$0xff]   ;;  %v1741_v9 = vld [vmem:[#allocation7 + $0x40] ss:$8 sps:$4 sm:$0xff]   ;;  %v1742_v10 = vld [vmem:[#allocation7 + $0x54] ss:$8 sps:$4 sm:$0xff]  }
  0x9c   : > { %v1744_v11 = vld [vmem:[#allocation7 + $0x50] ss:$8 sps:$4 sm:$0xff]   ;;  %v1745_v12 = vld [vmem:[#allocation7 + $0x64] ss:$8 sps:$4 sm:$0xff]   ;;  %v1747_v15 = vld [vmem:[#allocation7 + $0x60] ss:$8 sps:$4 sm:$0xff]  }
  0x9d   : > { %v392_v13 = vld [vmem:[%s2423_s18] sm:$0xff]  ;;  %v393_v14 = vld [vmem:[%s2423_s18 + $0x8] sm:$0xff]  ;;  %v394_v20 = vld [vmem:[%s2423_s18 + $0x10] sm:$0xff]  ;;  %s1542_s30 = sshll.u32 %s2412_s26, 8  ;;  %s1650_s13 = sshll.u32 %s2212_s25, 12 }
  0x9e   : > { %887 = vmatpush1.bf16.msra.mxu0 %v1732_v3  ;;  %v408_v16 = vunpack.c.l.bf16 %v392_v13  ;;  %v409_v17 = vunpack.c.h.bf16 %v392_v13  ;;  %v410_v18 = vunpack.c.l.bf16 %v393_v14  ;;  %v411_v19 = vunpack.c.h.bf16 %v393_v14  ;;  %v395_v21 = vld [vmem:[%s2423_s18 + $0x18] sm:$0xff]  ;;  %v396_v27 = vld [vmem:[%s2423_s18 + $0x20] sm:$0xff]  ;;  %v397_v34 = vld [vmem:[%s2423_s18 + $0x28] sm:$0xff]  ;;  %s2611_s4 = scalar_lea.vmem [#allocation10], %s1542_s30  ;;  %s2676_s0 = scalar_lea.hbm %s2732_s6, %s1650_s13 }
  0x9f   : > { %888 = vmatprep.subr.bf16.mxu0 %v1733_v4  ;;  %v1748_v22 = vld [vmem:[#allocation7 + $0x74] ss:$8 sps:$4 sm:$0xff]   ;;  %v413_v23 = vunpack.c.h.bf16 %v394_v20  ;;  %v415_v24 = vunpack.c.h.bf16 %v395_v21  ;;  %v1750_v30 = vld [vmem:[#allocation7 + $0x70] ss:$8 sps:$4 sm:$0xff]   ;;  %v412_v32 = vunpack.c.l.bf16 %v394_v20  ;;  %v414_v33 = vunpack.c.l.bf16 %v395_v21  ;;  %v1751_v35 = vld [vmem:[#allocation7 + $0x84] ss:$8 sps:$4 sm:$0xff]  }
  0xa0   : > { %v1543_v25 = vmul.f32 -1.442695, %v408_v16  ;;  %v1544_v26 = vmul.f32 -1.442695, %v409_v17  ;;  %v1545_v28 = vmul.f32 -1.442695, %v410_v18  ;;  %v417_v37 = vunpack.c.h.bf16 %v396_v27 }
  0xa1   : > { %v1546_v29 = vmul.f32 -1.442695, %v411_v19  ;;  %v1548_v31 = vmul.f32 -1.442695, %v413_v23  ;;  %v1550_v36 = vmul.f32 -1.442695, %v415_v24  ;;  %v419_v38 = vunpack.c.h.bf16 %v397_v34 }
  0xa2   : > { %889 = vmatpush1.bf16.msra.mxu0 %v1735_v5  ;;  %1823 = vpow2.f32 %v1544_v26  ;;  %v1547_v39 = vmul.f32 -1.442695, %v412_v32  ;;  %v2444_v40 = vld [vmem:[%s2423_s18 + $0x30] sm:$0xff]  ;;  %v1549_v41 = vmul.f32 -1.442695, %v414_v33  ;;  %v416_v44 = vunpack.c.l.bf16 %v396_v27  ;;  %v2454_v16 = vld [vmem:[%s2416_s2 + $0x8] sm:$0xff] }
  0xa3   : > { %890 = vmatprep.subr.bf16.mxu0 %v1736_v6  ;;  %1825 = vpow2.f32 %v1546_v29  ;;  %v1753_v42 = vld [vmem:[#allocation7 + $0x80] ss:$8 sps:$4 sm:$0xff]   ;;  %v1552_v43 = vmul.f32 -1.442695, %v417_v37  ;;  %v418_v45 = vunpack.c.l.bf16 %v397_v34  ;;  %v1754_v46 = vld [vmem:[#allocation7 + $0x94] ss:$8 sps:$4 sm:$0xff]   ;;  %v421_v48 = vunpack.c.h.bf16 %v2444_v40 }
  0xa4   : > { %1827 = vpow2.f32 %v1543_v25  ;;  %v1554_v47 = vmul.f32 -1.442695, %v419_v38  ;;  %v1551_v49 = vmul.f32 -1.442695, %v416_v44  ;;  %v1756_v50 = vld [vmem:[#allocation7 + $0x90] ss:$8 sps:$4 sm:$0xff]   ;;  %v420_v29 = vunpack.c.l.bf16 %v2444_v40 }
  0xa5   : > { %1829 = vpow2.f32 %v1545_v28  ;;  %v1553_v51 = vmul.f32 -1.442695, %v418_v45  ;;  %v1757_v52 = vld [vmem:[#allocation7 + $0xa4] ss:$8 sps:$4 sm:$0xff]   ;;  %v1556_v53 = vmul.f32 -1.442695, %v421_v48  ;;  %v363_v33 = vunpack.c.h.bf16 %v2454_v16 }
  0xa6   : > { %891 = vmatpush1.bf16.msra.mxu0 %v1738_v7  ;;  %1831 = vpow2.f32 %v1548_v31  ;;  %v1775_v54 = vld [vmem:[#allocation8 + $0x4] ss:$8 sps:$4 sm:$0xff]   ;;  %v1777_v55 = vld [vmem:[#allocation8] ss:$8 sps:$4 sm:$0xff]   ;;  %v1778_v62 = vld [vmem:[#allocation8 + $0x14] ss:$8 sps:$4 sm:$0xff]  }
  0xa7   : > { %892 = vmatprep.subr.bf16.mxu0 %v1739_v8  ;;  %1833 = vpow2.f32 %v1550_v36  ;;  %v1759_v58 = vld [vmem:[#allocation7 + $0xa0] ss:$8 sps:$4 sm:$0xff]   ;;  %1249 = vmatprep.subr.bf16.mxu1 %v1775_v54  ;;  %v1780_v63 = vld [vmem:[#allocation8 + $0x10] ss:$8 sps:$4 sm:$0xff]   ;;  %v1760_v1 = vld [vmem:[#allocation7 + $0xb4] ss:$8 sps:$4 sm:$0xff]  }
  0xa8   : > { %1835 = vpow2.f32 %v1547_v39  ;;  %1250 = vmatpush1.bf16.msra.mxu1 %v1777_v55  ;;  %v1781_v3 = vld [vmem:[#allocation8 + $0x24] ss:$8 sps:$4 sm:$0xff]   ;;  %v2448_v6 = vld [vmem:[%s2423_s18 + $0x38] sm:$0xff]  ;;  %v1783_v14 = vld [vmem:[#allocation8 + $0x20] ss:$8 sps:$4 sm:$0xff]   ;;  %s1409_s20 = sshll.u32 %s2611_s4, 4  ;;  %s2678_s20 = int_to_ptr.vmem [resolvable:$true] %s1409_s20 }
  0xa9   : > { %1837 = vpow2.f32 %v1549_v41  ;;  %1251 = vmatprep.subr.bf16.mxu1 %v1778_v62  ;;  %v1762_v8 = vld [vmem:[#allocation7 + $0xb0] ss:$8 sps:$4 sm:$0xff]   ;;  %v423_v18 = vunpack.c.h.bf16 %v2448_v6  ;;  %v1784_v19 = vld [vmem:[#allocation8 + $0x34] ss:$8 sps:$4 sm:$0xff]   ;;  %v1765_v21 = vld [vmem:[#allocation7 + $0xc0] ss:$8 sps:$4 sm:$0xff]  }
  0xaa   : > { %893 = vmatpush1.bf16.msra.mxu0 %v1741_v9  ;;  %1839 = vpow2.f32 %v1552_v43  ;;  %v2451_v9 = vld [vmem:[%s2416_s2] sm:$0xff]  ;;  %v1766_v26 = vld [vmem:[#allocation7 + $0xd4] ss:$8 sps:$4 sm:$0xff]   ;;  %v1786_v31 = vld [vmem:[#allocation8 + $0x30] ss:$8 sps:$4 sm:$0xff]   ;;  %v362_v43 = vunpack.c.l.bf16 %v2454_v16  ;;  %s1395_s25 = scalar_lea.sflag [#allocation4], %s2412_s26 }
  0xab   : > { %894 = vmatprep.subr.bf16.mxu0 %v1742_v10  ;;  %1841 = vpow2.f32 %v1554_v47  ;;  %v2459_v24 = vld [vmem:[%s2423_s18 + $0x40] sm:$0xff]  ;;  %v361_v27 = vunpack.c.h.bf16 %v2451_v9  ;;  %v1558_v38 = vmul.f32 -1.442695, %v423_v18  ;;  %v2477_v55 = vld [vmem:[%s2416_s2 + $0x10] sm:$0xff]  ;;  %s2067_s10 = scalar_lea.vmem %s2678_s20, 4096  ;;  %p2760_p13 = scmp.ne.s32.totalorder %s2750_s9, 0 }
  0xac   : > { %v1824_v56 = vpop.eup %1823  ;;  %1843 = vpow2.f32 %v1551_v49  ;;  %1252 = vmatpush1.bf16.msra.mxu1 %v1780_v63  ;;  %v425_v39 = vunpack.c.h.bf16 %v2459_v24  ;;  %v1787_v40 = vld [vmem:[#allocation8 + $0x44] ss:$8 sps:$4 sm:$0xff]   ;;  %p2068_p1 = scmp.ne.s32.totalorder %s2678_s20, %s2067_s10  ;;  %s2153_s12 = smov [#allocation10]  }
  0xad   : > { %v1826_v57 = vpop.eup %1825  ;;  %v537_v59 = vadd.f32 1.0, %v1824_v56  ;;  %1845 = vpow2.f32 %v1553_v51  ;;  %1253 = vmatprep.subr.bf16.mxu1 %v1781_v3  ;;  %v1769_v48 = vld [vmem:[#allocation7 + $0xe4] ss:$8 sps:$4 sm:$0xff]   ;;  %v424_v51 = vunpack.c.l.bf16 %v2459_v24  ;;  %v2480_v56 = vld [vmem:[%s2416_s2 + $0x18] sm:$0xff] }
  0xae   : > { %895 = vmatpush1.bf16.msra.mxu0 %v1744_v11  ;;  %v1828_v60 = vpop.eup %1827  ;;  %v539_v61 = vadd.f32 1.0, %v1826_v57  ;;  %1847 = vpow2.f32 %v1556_v53  ;;  %v1560_v62 = vmul.f32 -1.442695, %v425_v39  ;;  %v1793_v24 = vld [vmem:[#allocation8 + $0x64] ss:$8 sps:$4 sm:$0xff]   ;;  %p2069_p6 = pnand %p2068_p1, %p2760_p13 }
  0xaf   : > { %896 = vmatprep.subr.bf16.mxu0 %v1745_v12  ;;  %v1830_v0 = vpop.eup %1829  ;;  %1849 = vrcp.f32 %v537_v59  ;;  %v536_v2 = vadd.f32 1.0, %v1828_v60  ;;  %v1763_v12 = vld [vmem:[#allocation7 + $0xc4] ss:$8 sps:$4 sm:$0xff]   ;;  %v1789_v59 = vld [vmem:[#allocation8 + $0x40] ss:$8 sps:$4 sm:$0xff]  }
  0xb0   : > { %v1832_v4 = vpop.eup %1831  ;;  %1851 = vrcp.f32 %v539_v61  ;;  %v538_v5 = vadd.f32 1.0, %v1830_v0  ;;  %1254 = vmatpush1.bf16.msra.mxu1 %v1783_v14  ;;  %v2484_v0 = vld [vmem:[%s2423_s18 + $0x60] sm:$0xff]  ;;  %p2070_p10 = pneg %p2069_p6 }
  0xb1   : > { %v1834_v7 = vpop.eup %1833  ;;  %1853 = vrcp.f32 %v536_v2  ;;  %v541_v10 = vadd.f32 1.0, %v1832_v4  ;;  %1255 = vmatprep.subr.bf16.mxu1 %v1784_v19  ;;  %v1771_v2 = vld [vmem:[#allocation7 + $0xe0] ss:$8 sps:$4 sm:$0xff]   ;;  %v1792_v19 = vld [vmem:[#allocation8 + $0x50] ss:$8 sps:$4 sm:$0xff]  }
  0xb2   : > { %897 = vmatpush1.bf16.msra.mxu0 %v1747_v15  ;;  %v1836_v11 = vpop.eup %1835  ;;  %1855 = vrcp.f32 %v538_v5  ;;  %v543_v13 = vadd.f32 1.0, %v1834_v7 }
  0xb3   : > { %898 = vmatprep.subr.bf16.mxu0 %v1748_v22  ;;  %v1838_v15 = vpop.eup %1837  ;;  %1857 = vrcp.f32 %v541_v10  ;;  %v540_v17 = vadd.f32 1.0, %v1836_v11  ;;  %v360_v22 = vunpack.c.l.bf16 %v2451_v9  ;;  %v365_v11 = vunpack.c.h.bf16 %v2477_v55  ;;  %v2505_v9 = vld [vmem:[%s2416_s2 + $0x28] sm:$0xff] }
  0xb4   : > { %v1840_v20 = vpop.eup %1839  ;;  %1859 = vrcp.f32 %v543_v13  ;;  %v542_v23 = vadd.f32 1.0, %v1838_v15  ;;  %1256 = vmatpush1.bf16.msra.mxu1 %v1786_v31  ;;  %v2489_v13 = vld [vmem:[%s2423_s18 + $0x68] sm:$0xff]  ;;  %v367_v15 = vunpack.c.h.bf16 %v2480_v56 }
  0xb5   : > { %v1842_v25 = vpop.eup %1841  ;;  %1861 = vrcp.f32 %v540_v17  ;;  %v545_v28 = vadd.f32 1.0, %v1840_v20  ;;  %1257 = vmatprep.subr.bf16.mxu1 %v1787_v40 }
  0xb6   : > { %899 = vmatpush1.bf16.msra.mxu0 %v1750_v30  ;;  %v2464_v30 = vld [vmem:[%s2423_s18 + $0x48] sm:$0xff]  ;;  %v1844_v32 = vpop.eup %1843  ;;  %1863 = vrcp.f32 %v542_v23  ;;  %v547_v34 = vadd.f32 1.0, %v1842_v25  ;;  %v433_v23 = vunpack.c.h.bf16 %v2484_v0 }
  0xb7   : > { %900 = vmatprep.subr.bf16.mxu0 %v1751_v35  ;;  %v422_v35 = vunpack.c.l.bf16 %v2448_v6  ;;  %v1846_v36 = vpop.eup %1845  ;;  %1865 = vrcp.f32 %v545_v28  ;;  %v544_v37 = vadd.f32 1.0, %v1844_v32  ;;  %v427_v45 = vunpack.c.h.bf16 %v2464_v30  ;;  %v1790_v6 = vld [vmem:[#allocation8 + $0x54] ss:$8 sps:$4 sm:$0xff]   ;;  %v2499_v32 = vld [vmem:[%s2416_s2 + $0x20] sm:$0xff] }
  0xb8   : > { %v1848_v41 = vpop.eup %1847  ;;  %1867 = vrcp.f32 %v547_v34  ;;  %v546_v44 = vadd.f32 1.0, %v1846_v36  ;;  %1258 = vmatpush1.bf16.msra.mxu1 %v1789_v59  ;;  %v1568_v16 = vmul.f32 -1.442695, %v433_v23 }
  0xb9   : > { %v1850_v47 = vpop.eup %1849  ;;  %1869 = vrcp.f32 %v544_v37  ;;  %v549_v49 = vadd.f32 1.0, %v1848_v41  ;;  %v1557_v57 = vmul.f32 -1.442695, %v422_v35  ;;  %v1562_v3 = vmul.f32 -1.442695, %v427_v45  ;;  %1259 = vmatprep.subr.bf16.mxu1 %v1790_v6 }
  0xba   : > { %901 = vmatpush1.bf16.msra.mxu0 %v1753_v42  ;;  %v1768_v42 = vld [vmem:[#allocation7 + $0xd0] ss:$8 sps:$4 sm:$0xff]   ;;  %v1852_v53 = vpop.eup %1851  ;;  %v633_v54 = vmul.f32 %v1850_v47, %v361_v27  ;;  %1871 = vrcp.f32 %v546_v44  ;;  %v364_v41 = vunpack.c.l.bf16 %v2477_v55  ;;  %v369_v45 = vunpack.c.h.bf16 %v2499_v32 }
  0xbb   : > { %902 = vmatprep.subr.bf16.mxu0 %v1754_v46  ;;  %v402_v46 = vld [vmem:[%s2423_s18 + $0x50] sm:$0xff]  ;;  %v1854_v60 = vpop.eup %1853  ;;  %v635_v61 = vmul.f32 %v1852_v53, %v363_v33  ;;  %1873 = vpow2.f32 %v1558_v38  ;;  %v435_v33 = vunpack.c.h.bf16 %v2489_v13  ;;  %v1795_v38 = vld [vmem:[#allocation8 + $0x60] ss:$8 sps:$4 sm:$0xff]   ;;  %v1799_v53 = vld [vmem:[#allocation8 + $0x84] ss:$8 sps:$4 sm:$0xff]  }
  0xbc   : > { %v429_v63 = vunpack.c.h.bf16 %v402_v46  ;;  %1875 = vrcp.f32 %v549_v49  ;;  %v428_v5 = vunpack.c.l.bf16 %v402_v46  ;;  %1260 = vmatpush1.bf16.msra.mxu1 %v1792_v19  ;;  %v371_v49 = vunpack.c.h.bf16 %v2505_v9 }
  0xbd   : > { %v665_v10 = vpack.c.bf16 %v635_v61, %v633_v54  ;;  %1261 = vmatprep.subr.bf16.mxu1 %v1793_v24  ;;  %v1570_v46 = vmul.f32 -1.442695, %v435_v33  ;;  %v407_v24 = vld [vmem:[%s2423_s18 + $0x78] sm:$0xff] }
  0xbe   : > { %903 = vmatpush1.bf16.msra.mxu0 %v1756_v50  ;;  %v1555_v50 = vmul.f32 -1.442695, %v420_v29  ;;  %v1563_v28 = vmul.f32 -1.442695, %v428_v5  ;;  %v1802_v5 = vld [vmem:[#allocation8 + $0x94] ss:$8 sps:$4 sm:$0xff]  }
  0xbf   : > { %904 = vmatprep.subr.bf16.mxu0 %v1757_v52  ;;  %v2474_v52 = vld [vmem:[%s2423_s18 + $0x58] sm:$0xff]  ;;  %916 = vmatprep.mubr.bf16.mxu0 %v665_v10 }
  0xc0   : > { %v431_v4 = vunpack.c.h.bf16 %v2474_v52  ;;  %1877 = vpow2.f32 %v1555_v50  ;;  %v430_v18 = vunpack.c.l.bf16 %v2474_v52  ;;  %1262 = vmatpush1.bf16.msra.mxu1 %v1795_v38 }
  0xc1   : > { %1879 = vpow2.f32 %v1557_v57 }
  0xc2   : > { %905 = vmatpush1.bf16.msra.mxu0 %v1759_v58  ;;  %v426_v58 = vunpack.c.l.bf16 %v2464_v30  ;;  %1881 = vpow2.f32 %v1560_v62  ;;  %v1566_v27 = vmul.f32 -1.442695, %v431_v4  ;;  %v632_v30 = vmul.f32 %v1854_v60, %v360_v22  ;;  %v1796_v22 = vld [vmem:[#allocation8 + $0x74] ss:$8 sps:$4 sm:$0xff]  }
  0xc3   : > { %906 = vmatprep.subr.bf16.mxu0 %v1760_v1  ;;  %v1856_v1 = vpop.eup %1855  ;;  %1883 = vpow2.f32 %v1562_v3  ;;  %v1565_v37 = vmul.f32 -1.442695, %v430_v18  ;;  %1263 = vmatprep.subr.bf16.mxu1 %v1796_v22  ;;  %v2516_v3 = vld [vmem:[%s2416_s2 + $0x30] sm:$0xff] }
  0xc4   : > { %v1858_v7 = vpop.eup %1857  ;;  %v1561_v17 = vmul.f32 -1.442695, %v426_v58  ;;  %v634_v31 = vmul.f32 %v1856_v1, %v362_v43  ;;  %v1801_v1 = vld [vmem:[#allocation8 + $0x80] ss:$8 sps:$4 sm:$0xff]   ;;  %v406_v18 = vld [vmem:[%s2423_s18 + $0x70] sm:$0xff] }
  0xc5   : > { %v1860_v14 = vpop.eup %1859  ;;  %v637_v35 = vmul.f32 %v1858_v7, %v365_v11  ;;  %v368_v7 = vunpack.c.l.bf16 %v2499_v32  ;;  %v432_v11 = vunpack.c.l.bf16 %v2484_v0  ;;  %v434_v0 = vunpack.c.l.bf16 %v2489_v13 }
  0xc6   : > { %907 = vmatpush1.bf16.msra.mxu0 %v1762_v8  ;;  %v1772_v8 = vld [vmem:[#allocation7 + $0xf4] ss:$8 sps:$4 sm:$0xff]   ;;  %v1862_v20 = vpop.eup %1861  ;;  %v639_v36 = vmul.f32 %v1860_v14, %v367_v15  ;;  %v664_v44 = vpack.c.bf16 %v634_v31, %v632_v30  ;;  %v370_v15 = vunpack.c.l.bf16 %v2505_v9  ;;  %v437_v33 = vunpack.c.h.bf16 %v406_v18  ;;  %v2533_v9 = vld [vmem:[%s2416_s2 + $0x40] sm:$0xff] }
  0xc7   : > { %908 = vmatprep.subr.bf16.mxu0 %v1763_v12  ;;  %v1559_v12 = vmul.f32 -1.442695, %v424_v51  ;;  %v1864_v25 = vpop.eup %1863  ;;  %v1798_v51 = vld [vmem:[#allocation8 + $0x70] ss:$8 sps:$4 sm:$0xff]   ;;  %v636_v57 = vmul.f32 %v1862_v20, %v364_v41  ;;  %v1567_v32 = vmul.f32 -1.442695, %v432_v11  ;;  %v436_v22 = vunpack.c.l.bf16 %v406_v18 }
  0xc8   : > { %v1866_v29 = vpop.eup %1865  ;;  %1264 = vmatpush1.bf16.msra.mxu1 %v1798_v51  ;;  %v1807_v41 = vld [vmem:[#allocation8 + $0xa0] ss:$8 sps:$4 sm:$0xff]   ;;  %v1814_v11 = vld [vmem:[#allocation8 + $0xd4] ss:$8 sps:$4 sm:$0xff]  }
  0xc9   : > { %1885 = vpow2.f32 %v1559_v12  ;;  %v1868_v34 = vpop.eup %1867  ;;  %v641_v61 = vmul.f32 %v1866_v29, %v369_v45  ;;  %1265 = vmatprep.subr.bf16.mxu1 %v1799_v53  ;;  %v1805_v29 = vld [vmem:[#allocation8 + $0xa4] ss:$8 sps:$4 sm:$0xff]   ;;  %v1808_v45 = vld [vmem:[#allocation8 + $0xb4] ss:$8 sps:$4 sm:$0xff]  }
  0xca   : > { %909 = vmatpush1.bf16.msra.mxu0 %v1765_v21  ;;  %v1564_v21 = vmul.f32 -1.442695, %v429_v63  ;;  %1887 = vpow2.f32 %v1561_v17  ;;  %v2502_v39 = vpop.eup %1869  ;;  %v643_v62 = vmul.f32 %v1868_v34, %v371_v49  ;;  %v1572_v49 = vmul.f32 -1.442695, %v437_v33 }
  0xcb   : > { %910 = vmatprep.subr.bf16.mxu0 %v1766_v26  ;;  %v1774_v26 = vld [vmem:[#allocation7 + $0xf0] ss:$8 sps:$4 sm:$0xff]   ;;  %v2507_v40 = vpop.eup %1871 }
  0xcc   : > { %1889 = vpow2.f32 %v1564_v21  ;;  %v1874_v43 = vpop.eup %1873  ;;  %v669_v20 = vpack.c.bf16 %v643_v62, %v641_v61  ;;  %v373_v21 = vunpack.c.h.bf16 %v2516_v3  ;;  %1266 = vmatpush1.bf16.msra.mxu1 %v1801_v1  ;;  %v1811_v61 = vld [vmem:[#allocation8 + $0xc4] ss:$8 sps:$4 sm:$0xff]  }
  0xcd   : > { %1891 = vpow2.f32 %v1566_v27  ;;  %v2512_v47 = vpop.eup %1875  ;;  %v551_v50 = vadd.f32 1.0, %v1874_v43  ;;  %1267 = vmatprep.subr.bf16.mxu1 %v1802_v5 }
  0xce   : > { %911 = vmatpush1.bf16.msra.mxu0 %v1768_v42  ;;  %v366_v42 = vunpack.c.l.bf16 %v2480_v56  ;;  %1893 = vpow2.f32 %v1563_v28  ;;  %v1878_v52 = vpop.eup %1877  ;;  %v645_v13 = vmul.f32 %v2512_v47, %v373_v21 }
  0xcf   : > { %912 = vmatprep.subr.bf16.mxu0 %v1769_v48  ;;  %v667_v48 = vpack.c.bf16 %v639_v36, %v637_v35  ;;  %1895 = vpow2.f32 %v1565_v37  ;;  %v1880_v54 = vpop.eup %1879  ;;  %v548_v55 = vadd.f32 1.0, %v1878_v52  ;;  %v640_v35 = vmul.f32 %v2502_v39, %v368_v7 }
  0xd0   : > { %1897 = vpow2.f32 %v1568_v16  ;;  %v1882_v56 = vpop.eup %1881  ;;  %v638_v58 = vmul.f32 %v1864_v25, %v366_v42  ;;  %v550_v59 = vadd.f32 1.0, %v1880_v54  ;;  %v1804_v25 = vld [vmem:[#allocation8 + $0x90] ss:$8 sps:$4 sm:$0xff]   ;;  %v642_v36 = vmul.f32 %v2507_v40, %v370_v15 }
  0xd1   : > { %1899 = vrcp.f32 %v551_v50  ;;  %v1884_v60 = vpop.eup %1883  ;;  %v553_v63 = vadd.f32 1.0, %v1882_v56  ;;  %v439_v37 = vunpack.c.h.bf16 %v407_v24  ;;  %1268 = vmatpush1.bf16.msra.mxu1 %v1804_v25  ;;  %v1569_v39 = vmul.f32 -1.442695, %v434_v0 }
  0xd2   : > { %913 = vmatpush1.bf16.msra.mxu0 %v1771_v2  ;;  %1901 = vpow2.f32 %v1570_v46  ;;  %v555_v4 = vadd.f32 1.0, %v1884_v60  ;;  %v666_v14 = vpack.c.bf16 %v638_v58, %v636_v57  ;;  %v438_v40 = vunpack.c.l.bf16 %v407_v24  ;;  %1269 = vmatprep.subr.bf16.mxu1 %v1805_v29  ;;  %v1810_v58 = vld [vmem:[#allocation8 + $0xb0] ss:$8 sps:$4 sm:$0xff]  }
  0xd3   : > { %914 = vmatprep.subr.bf16.mxu0 %v1772_v8  ;;  %1903 = vrcp.f32 %v548_v55  ;;  %v1886_v2 = vpop.eup %1885  ;;  %v2520_v8 = vld [vmem:[%s2416_s2 + $0x38] sm:$0xff]  ;;  %v668_v51 = vpack.c.bf16 %v642_v36, %v640_v35  ;;  %v377_v52 = vunpack.c.h.bf16 %v2533_v9  ;;  %v1574_v53 = vmul.f32 -1.442695, %v439_v37  ;;  %v357_v35 = vld [vmem:[%s2416_s2 + $0x68] sm:$0xff] }
  0xd4   : > { %1905 = vrcp.f32 %v550_v59  ;;  %v1888_v6 = vpop.eup %1887  ;;  %v552_v10 = vadd.f32 1.0, %v1886_v2  ;;  %v375_v27 = vunpack.c.h.bf16 %v2520_v8  ;;  %v374_v47 = vunpack.c.l.bf16 %v2520_v8  ;;  %v354_v8 = vld [vmem:[%s2416_s2 + $0x50] sm:$0xff] }
  0xd5   : > { %1907 = vrcp.f32 %v553_v63  ;;  %v554_v17 = vadd.f32 1.0, %v1888_v6  ;;  %v1571_v57 = vmul.f32 -1.442695, %v436_v22  ;;  %1270 = vmatpush1.bf16.msra.mxu1 %v1807_v41  ;;  %v1573_v60 = vmul.f32 -1.442695, %v438_v40 }
  0xd6   : > { %915 = vmatpush1.bf16.msra.mxu0 %v1774_v26  ;;  %v1890_v12 = vpop.eup %1889  ;;  %1909 = vrcp.f32 %v555_v4  ;;  %1271 = vmatprep.subr.bf16.mxu1 %v1808_v45  ;;  %v1813_v6 = vld [vmem:[#allocation8 + $0xc0] ss:$8 sps:$4 sm:$0xff]   ;;  %v381_v21 = vunpack.c.h.bf16 %v354_v8 }
  0xd7   : > { %v1892_v19 = vpop.eup %1891  ;;  %v557_v23 = vadd.f32 1.0, %v1890_v12  ;;  %1911 = vrcp.f32 %v552_v10  ;;  %v355_v10 = vld [vmem:[%s2416_s2 + $0x58] sm:$0xff] }
  0xd8   : > { %v1894_v26 = vpop.eup %1893  ;;  %v559_v28 = vadd.f32 1.0, %v1892_v19  ;;  %1913 = vrcp.f32 %v554_v17  ;;  %v376_v17 = vunpack.c.l.bf16 %v2533_v9  ;;  %v382_v22 = vunpack.c.l.bf16 %v355_v10 }
  0xd9   : > { %917 = vmatmul.mubr.bf16.vlgmr.msra.gmra.mrb[0].mxu0 %v664_v44  ;;  %v1896_v30 = vpop.eup %1895  ;;  %v556_v31 = vadd.f32 1.0, %v1894_v26  ;;  %1915 = vrcp.f32 %v557_v23  ;;  %v2536_v44 = vld [vmem:[%s2416_s2 + $0x48] sm:$0xff]  ;;  %1272 = vmatpush1.bf16.msra.mxu1 %v1810_v58  ;;  %v383_v23 = vunpack.c.h.bf16 %v355_v10 }
  0xda   : > { %926 = vmatprep.mubr.bf16.mxu0 %v667_v48  ;;  %v1898_v34 = vpop.eup %1897  ;;  %v558_v16 = vadd.f32 1.0, %v1896_v30  ;;  %1917 = vrcp.f32 %v559_v28  ;;  %v372_v48 = vunpack.c.l.bf16 %v2516_v3  ;;  %v379_v56 = vunpack.c.h.bf16 %v2536_v44  ;;  %1273 = vmatprep.subr.bf16.mxu1 %v1811_v61 }
  0xdb   : > { %v1900_v38 = vpop.eup %1899  ;;  %1919 = vrcp.f32 %v556_v31  ;;  %v561_v62 = vadd.f32 1.0, %v1898_v34  ;;  %v378_v18 = vunpack.c.l.bf16 %v2536_v44  ;;  %v356_v34 = vld [vmem:[%s2416_s2 + $0x60] sm:$0xff]  ;;  %v387_v44 = vunpack.c.h.bf16 %v357_v35 }
  0xdc   : > { %v1902_v42 = vpop.eup %1901  ;;  %v647_v43 = vmul.f32 %v1900_v38, %v375_v27  ;;  %1921 = vpow2.f32 %v1567_v32 }
  0xdd   : > { %v1904_v46 = vpop.eup %1903  ;;  %1923 = vrcp.f32 %v558_v16  ;;  %v563_v2 = vadd.f32 1.0, %v1902_v42  ;;  %1274 = vmatpush1.bf16.msra.mxu1 %v1813_v6  ;;  %v380_v16 = vunpack.c.l.bf16 %v354_v8 }
  0xde   : > { %v1906_v50 = vpop.eup %1905  ;;  %v671_v55 = vpack.c.bf16 %v647_v43, %v645_v13  ;;  %1925 = vpow2.f32 %v1569_v39  ;;  %v644_v63 = vmul.f32 %v1904_v46, %v372_v48  ;;  %1275 = vmatprep.subr.bf16.mxu1 %v1814_v11  ;;  %v385_v43 = vunpack.c.h.bf16 %v356_v34 }
  0xdf   : > { %v1908_v54 = vpop.eup %1907  ;;  %1927 = vpow2.f32 %v1572_v49  ;;  %v646_v1 = vmul.f32 %v1906_v50, %v374_v47  ;;  %v358_v50 = vld [vmem:[%s2416_s2 + $0x70] sm:$0xff] }
  0xe0   : > { %v1910_v59 = vpop.eup %1909  ;;  %1929 = vpow2.f32 %v1574_v53  ;;  %v649_v4 = vmul.f32 %v1908_v54, %v377_v52  ;;  %v384_v54 = vunpack.c.l.bf16 %v356_v34  ;;  %v389_v58 = vunpack.c.h.bf16 %v358_v50 }
  0xe1   : > { %927 = vmatmul.mubr.bf16.gmra.mrb[4].mxu0 %v666_v14  ;;  %v1912_v3 = vpop.eup %1911  ;;  %v651_v5 = vmul.f32 %v1910_v59, %v379_v56  ;;  %1931 = vpow2.f32 %v1571_v57  ;;  %v670_v15 = vpack.c.bf16 %v646_v1, %v644_v63 }
  0xe2   : > { %936 = vmatprep.mubr.bf16.mxu0 %v669_v20  ;;  %v1914_v7 = vpop.eup %1913  ;;  %1933 = vpow2.f32 %v1573_v60  ;;  %v648_v28 = vmul.f32 %v1912_v3, %v376_v17  ;;  %v1819_v17 = vld [vmem:[#allocation8 + $0xe0] ss:$8 sps:$4 sm:$0xff]  }
  0xe3   : > { %v1916_v12 = vpop.eup %1915  ;;  %1935 = vrcp.f32 %v561_v62  ;;  %v673_v20 = vpack.c.bf16 %v651_v5, %v649_v4  ;;  %v650_v0 = vmul.f32 %v1914_v7, %v378_v18  ;;  %v388_v5 = vunpack.c.l.bf16 %v358_v50  ;;  %v1820_v18 = vld [vmem:[#allocation8 + $0xf4] ss:$8 sps:$4 sm:$0xff]  }
  0xe4   : > { %v1918_v14 = vpop.eup %1917  ;;  %1937 = vrcp.f32 %v563_v2  ;;  %v653_v30 = vmul.f32 %v1916_v12, %v381_v21 }
  0xe5   : > { %v1920_v19 = vpop.eup %1919  ;;  %v655_v31 = vmul.f32 %v1918_v14, %v383_v23  ;;  %v672_v9 = vpack.c.bf16 %v650_v0, %v648_v28  ;;  %v1816_v14 = vld [vmem:[#allocation8 + $0xd0] ss:$8 sps:$4 sm:$0xff]  }
  0xe6   : > { %v1922_v24 = vpop.eup %1921  ;;  %v652_v46 = vmul.f32 %v1920_v19, %v380_v16  ;;  %1276 = vmatpush1.bf16.msra.mxu1 %v1816_v14  ;;  %v1822_v19 = vld [vmem:[#allocation8 + $0xf0] ss:$8 sps:$4 sm:$0xff]  }
  0xe7   : > { %v1924_v25 = vpop.eup %1923  ;;  %v560_v26 = vadd.f32 1.0, %v1922_v24  ;;  %v675_v42 = vpack.c.bf16 %v655_v31, %v653_v30  ;;  %v712_v24 = vld [vmem:[%s2729_s3] sm:$0x3] }
  0xe8   : > { %v1926_v27 = vpop.eup %1925  ;;  %v654_v48 = vmul.f32 %v1924_v25, %v382_v22 }
  0xe9   : > { %937 = vmatmul.mubr.bf16.gmra.mrb[8].mxu0 %v668_v51  ;;  %v1928_v29 = vpop.eup %1927  ;;  %v562_v32 = vadd.f32 1.0, %v1926_v27  ;;  %1939 = vrcp.f32 %v560_v26  ;;  %v359_v51 = vld [vmem:[%s2416_s2 + $0x78] sm:$0xff]  ;;  %s2071_s2 = sshll.u32 %s2153_s12, 4  ;;  %s2072_s2 = int_to_ptr.vmem [resolvable:$false] %s2071_s2 }
  0xea   : > { %946 = vmatprep.mubr.bf16.mxu0 %v671_v55  ;;  %v1930_v33 = vpop.eup %1929  ;;  %v565_v36 = vadd.f32 1.0, %v1928_v29  ;;  %v674_v53 = vpack.c.bf16 %v654_v48, %v652_v46  ;;  %v386_v55 = vunpack.c.l.bf16 %v357_v35  ;;  %v391_v59 = vunpack.c.h.bf16 %v359_v51  ;;  %s2073_s19 = scalar_lea.vmem %s2072_s2, 8192  ;;  %p2074_p4 = scmp.lt.s32.totalorder %s2678_s20, %s2072_s2 }
  0xeb   : > { %v1932_v37 = vpop.eup %1931  ;;  %1941 = vrcp.f32 %v562_v32  ;;  %v567_v38 = vadd.f32 1.0, %v1930_v33  ;;  %v390_v6 = vunpack.c.l.bf16 %v359_v51  ;;  %p2075_p5 = scmp.lt.s32.totalorder %s2073_s19, %s2067_s10 }
  0xec   : > { %v1934_v13 = vpop.eup %1933  ;;  %1943 = vrcp.f32 %v565_v36  ;;  %v564_v40 = vadd.f32 1.0, %v1932_v37 }
  0xed   : > { %v1936_v41 = vpop.eup %1935  ;;  %1945 = vrcp.f32 %v567_v38  ;;  %v566_v45 = vadd.f32 1.0, %v1934_v13  ;;  %p2076_p3 = por %p2075_p5, %p2074_p4 }
  0xee   : > { %v1938_v39 = vpop.eup %1937  ;;  %v657_v47 = vmul.f32 %v1936_v41, %v385_v43  ;;  %1947 = vrcp.f32 %v564_v40 }
  0xef   : > { %v659_v49 = vmul.f32 %v1938_v39, %v387_v44  ;;  %1949 = vrcp.f32 %v566_v45  ;;  %p2077_p7 = pnand %p2076_p3, %p2070_p10 }
  0xf1   : > { %947 = vmatmul.mubr.bf16.gmra.mrb[12].mxu0 %v670_v15  ;;  %v677_v57 = vpack.c.bf16 %v659_v49, %v657_v47  ;;  %v1817_v15 = vld [vmem:[#allocation8 + $0xe4] ss:$8 sps:$4 sm:$0xff]  }
  0xf2   : > { %956 = vmatprep.mubr.bf16.mxu0 %v673_v20  ;;  %1277 = vmatprep.subr.bf16.mxu1 %v1817_v15  ;;  %v714_v20 = vlaneseq }
  0xf3   : > { %v1940_v52 = vpop.eup %1939  ;;  %1278 = vmatpush1.bf16.msra.mxu1 %v1819_v17 }
  0xf4   : > { %v656_v62 = vmul.f32 %v1940_v52, %v384_v54  ;;  %1279 = vmatprep.subr.bf16.mxu1 %v1820_v18  ;;  %v2550_v21 = vshrl.u32 %v714_v20, 7 }
  0xf5   : > { %v1942_v56 = vpop.eup %1941 }
  0xf6   : > { %v1944_v60 = vpop.eup %1943  ;;  %v658_v63 = vmul.f32 %v1942_v56, %v386_v55  ;;  %v716_v23 = vsub.s32 0, %v2550_v21  ;;  %v720_v25 = vsub.s32 1, %v2550_v21 }
  0xf7   : > { %v1946_v61 = vpop.eup %1945  ;;  %v661_v1 = vmul.f32 %v1944_v60, %v389_v58  ;;  %1280 = vmatpush1.bf16.msra.mxu1 %v1822_v19 }
  0xf8   : > { %v663_v2 = vmul.f32 %v1946_v61, %v391_v59  ;;  %v1948_v3 = vpop.eup %1947  ;;  %v676_v4 = vpack.c.bf16 %v658_v63, %v656_v62  ;;  %v2559_v26 = vrot.slane %v712_v24, %v716_v23  ;;  %v2563_v27 = vrot.slane %v712_v24, %v720_v25 }
  0xf9   : > { %957 = vmatmul.mubr.bf16.gmra.mrb[16].mxu0 %v672_v9  ;;  %v1950_v7 = vpop.eup %1949  ;;  %v660_v10 = vmul.f32 %v1948_v3, %v388_v5 }
  0xfa   : > { %966 = vmatprep.mubr.bf16.mxu0 %v675_v42  ;;  %v679_v8 = vpack.c.bf16 %v663_v2, %v661_v1  ;;  %v662_v11 = vmul.f32 %v1950_v7, %v390_v6 }
  0xfc   : > { %v678_v12 = vpack.c.bf16 %v662_v11, %v660_v10 }
 0x101   : > { %967 = vmatmul.mubr.bf16.gmra.mrb[20].mxu0 %v674_v53 }
 0x102   : > { %976 = vmatprep.mubr.bf16.mxu0 %v677_v57 }
 0x109   : > { %977 = vmatmul.mubr.bf16.gmra.mrb[24].mxu0 %v676_v4 }
 0x10a   : > { %986 = vmatprep.mubr.bf16.mxu0 %v679_v8 }
 0x111   : > { %987 = vmatmul.mubr.bf16.gmra.mrb[28].mxu0 %v678_v12 }
 0x1ac   : > { %v918_v28 = vpop.f32.mrb[0].mxu0 }
 0x1ad   : > { %v919_v0 = vadd.f32 %v918_v28, %v2559_v26  ;;  %v920_v29 = vpop.f32.mrb[1].mxu0 }
 0x1ae   : > { %v921_v30 = vadd.f32 %v920_v29, %v2563_v27  ;;  %v922_v31 = vpop.f32.mrb[2].mxu0 }
 0x1af   : > { %v923_v32 = vadd.f32 %v922_v31, %v2559_v26  ;;  %v924_v33 = vpop.f32.mrb[3].mxu0  ;;  %v997_v35 = vmax.f32 %v919_v0, 0.0 }
 0x1b0   : > { %v925_v34 = vadd.f32 %v924_v33, %v2563_v27  ;;  %v998_v37 = vmax.f32 %v921_v30, 0.0 }
 0x1b1   : > { %v999_v36 = vmax.f32 %v923_v32, 0.0 }
 0x1b2   : > { %v1000_v38 = vmax.f32 %v925_v34, 0.0 }
 0x1b3   : > { %v1029_v13 = vpack.c.bf16 %v999_v36, %v997_v35 }
 0x1b4   : > { %v928_v9 = vpop.f32.mrb[4].mxu0  ;;  %v1030_v16 = vpack.c.bf16 %v1000_v38, %v998_v37 }
 0x1b5   : > { %v929_v22 = vadd.f32 %v928_v9, %v2559_v26  ;;  %v930_v41 = vpop.f32.mrb[5].mxu0 }
 0x1b6   : > { %v931_v42 = vadd.f32 %v930_v41, %v2563_v27  ;;  %v932_v43 = vpop.f32.mrb[6].mxu0  ;;  %1281 = vmatprep.mubr.bf16.mxu1 %v1030_v16 }
 0x1b7   : > { %v933_v44 = vadd.f32 %v932_v43, %v2559_v26  ;;  %v934_v39 = vpop.f32.mrb[7].mxu0  ;;  %1282 = vmatmul.mubr.bf16.vlgmr.msra.gmra.mrb[0].mxu1 %v1029_v13  ;;  %v1001_v45 = vmax.f32 %v929_v22, 0.0 }
 0x1b8   : > { %v935_v40 = vadd.f32 %v934_v39, %v2563_v27  ;;  %v1002_v48 = vmax.f32 %v931_v42, 0.0 }
 0x1b9   : > { %v1003_v46 = vmax.f32 %v933_v44, 0.0 }
 0x1ba   : > { %v1004_v47 = vmax.f32 %v935_v40, 0.0 }
 0x1bb   : > { %v1031_v49 = vpack.c.bf16 %v1003_v46, %v1001_v45 }
 0x1bc   : > { %v1032_v50 = vpack.c.bf16 %v1004_v47, %v1002_v48  ;;  %v938_v51 = vpop.f32.mrb[8].mxu0 }
 0x1bd   : > { %v939_v52 = vadd.f32 %v938_v51, %v2559_v26  ;;  %v940_v53 = vpop.f32.mrb[9].mxu0 }
 0x1be   : > { %v941_v54 = vadd.f32 %v940_v53, %v2563_v27  ;;  %v942_v55 = vpop.f32.mrb[10].mxu0  ;;  %1291 = vmatprep.mubr.bf16.mxu1 %v1032_v50 }
 0x1bf   : > { %v943_v56 = vadd.f32 %v942_v55, %v2559_v26  ;;  %v944_v57 = vpop.f32.mrb[11].mxu0  ;;  %1292 = vmatmul.mubr.bf16.gmra.mrb[4].mxu1 %v1031_v49  ;;  %v1005_v59 = vmax.f32 %v939_v52, 0.0 }
 0x1c0   : > { %v945_v58 = vadd.f32 %v944_v57, %v2563_v27  ;;  %v1006_v61 = vmax.f32 %v941_v54, 0.0 }
 0x1c1   : > { %v1007_v60 = vmax.f32 %v943_v56, 0.0 }
 0x1c2   : > { %v1008_v62 = vmax.f32 %v945_v58, 0.0 }
 0x1c3   : > { %v1033_v63 = vpack.c.bf16 %v1007_v60, %v1005_v59 }
 0x1c4   : > { %v1034_v1 = vpack.c.bf16 %v1008_v62, %v1006_v61  ;;  %v948_v2 = vpop.f32.mrb[12].mxu0 }
 0x1c5   : > { %v949_v3 = vadd.f32 %v948_v2, %v2559_v26  ;;  %v950_v4 = vpop.f32.mrb[13].mxu0 }
 0x1c6   : > { %v951_v5 = vadd.f32 %v950_v4, %v2563_v27  ;;  %v952_v6 = vpop.f32.mrb[14].mxu0  ;;  %1301 = vmatprep.mubr.bf16.mxu1 %v1034_v1 }
 0x1c7   : > { %v953_v7 = vadd.f32 %v952_v6, %v2559_v26  ;;  %v954_v8 = vpop.f32.mrb[15].mxu0  ;;  %1302 = vmatmul.mubr.bf16.gmra.mrb[8].mxu1 %v1033_v63  ;;  %v1009_v11 = vmax.f32 %v949_v3, 0.0 }
 0x1c8   : > { %v955_v10 = vadd.f32 %v954_v8, %v2563_v27  ;;  %v1010_v14 = vmax.f32 %v951_v5, 0.0 }
 0x1c9   : > { %v1011_v12 = vmax.f32 %v953_v7, 0.0 }
 0x1ca   : > { %v1012_v15 = vmax.f32 %v955_v10, 0.0 }
 0x1cb   : > { %v1035_v17 = vpack.c.bf16 %v1011_v12, %v1009_v11 }
 0x1cc   : > { %v1036_v18 = vpack.c.bf16 %v1012_v15, %v1010_v14  ;;  %v958_v19 = vpop.f32.mrb[16].mxu0  ;;  %v1077_v15 = vld [vmem:[%s2731_s5] sm:$0x3] }
 0x1cd   : > { %v959_v20 = vadd.f32 %v958_v19, %v2559_v26  ;;  %v960_v24 = vpop.f32.mrb[17].mxu0 }
 0x1ce   : > { %v961_v28 = vadd.f32 %v960_v24, %v2563_v27  ;;  %v962_v0 = vpop.f32.mrb[18].mxu0  ;;  %1311 = vmatprep.mubr.bf16.mxu1 %v1036_v18 }
 0x1cf   : > { %v963_v29 = vadd.f32 %v962_v0, %v2559_v26  ;;  %v964_v30 = vpop.f32.mrb[19].mxu0  ;;  %1312 = vmatmul.mubr.bf16.gmra.mrb[12].mxu1 %v1035_v17  ;;  %v1013_v32 = vmax.f32 %v959_v20, 0.0 }
 0x1d0   : > { %v965_v31 = vadd.f32 %v964_v30, %v2563_v27  ;;  %v1014_v34 = vmax.f32 %v961_v28, 0.0 }
 0x1d1   : > { %v1015_v33 = vmax.f32 %v963_v29, 0.0 }
 0x1d2   : > { %v1016_v35 = vmax.f32 %v965_v31, 0.0 }
 0x1d3   : > { %v1037_v36 = vpack.c.bf16 %v1015_v33, %v1013_v32 }
 0x1d4   : > { %v1038_v37 = vpack.c.bf16 %v1016_v35, %v1014_v34  ;;  %v968_v38 = vpop.f32.mrb[20].mxu0 }
 0x1d5   : > { %v969_v13 = vadd.f32 %v968_v38, %v2559_v26  ;;  %v970_v9 = vpop.f32.mrb[21].mxu0 }
 0x1d6   : > { %v971_v16 = vadd.f32 %v970_v9, %v2563_v27  ;;  %v972_v22 = vpop.f32.mrb[22].mxu0  ;;  %1321 = vmatprep.mubr.bf16.mxu1 %v1038_v37 }
 0x1d7   : > { %v973_v41 = vadd.f32 %v972_v22, %v2559_v26  ;;  %v974_v42 = vpop.f32.mrb[23].mxu0  ;;  %1322 = vmatmul.mubr.bf16.gmra.mrb[16].mxu1 %v1037_v36  ;;  %v1017_v44 = vmax.f32 %v969_v13, 0.0 }
 0x1d8   : > { %v975_v43 = vadd.f32 %v974_v42, %v2563_v27  ;;  %v1018_v40 = vmax.f32 %v971_v16, 0.0 }
 0x1d9   : > { %v1019_v39 = vmax.f32 %v973_v41, 0.0 }
 0x1da   : > { %v1020_v45 = vmax.f32 %v975_v43, 0.0 }
 0x1db   : > { %v1039_v46 = vpack.c.bf16 %v1019_v39, %v1017_v44 }
 0x1dc   : > { %v1040_v48 = vpack.c.bf16 %v1020_v45, %v1018_v40  ;;  %v978_v47 = vpop.f32.mrb[24].mxu0 }
 0x1dd   : > { %v979_v49 = vadd.f32 %v978_v47, %v2559_v26  ;;  %v980_v50 = vpop.f32.mrb[25].mxu0 }
 0x1de   : > { %v981_v51 = vadd.f32 %v980_v50, %v2563_v27  ;;  %v982_v52 = vpop.f32.mrb[26].mxu0  ;;  %1331 = vmatprep.mubr.bf16.mxu1 %v1040_v48 }
 0x1df   : > { %v983_v53 = vadd.f32 %v982_v52, %v2559_v26  ;;  %v984_v54 = vpop.f32.mrb[27].mxu0  ;;  %1332 = vmatmul.mubr.bf16.gmra.mrb[20].mxu1 %v1039_v46  ;;  %v1021_v56 = vmax.f32 %v979_v49, 0.0 }
 0x1e0   : > { %v985_v55 = vadd.f32 %v984_v54, %v2563_v27  ;;  %v1022_v58 = vmax.f32 %v981_v51, 0.0 }
 0x1e1   : > { %v1023_v57 = vmax.f32 %v983_v53, 0.0 }
 0x1e2   : > { %v1024_v59 = vmax.f32 %v985_v55, 0.0 }
 0x1e3   : > { %v1041_v60 = vpack.c.bf16 %v1023_v57, %v1021_v56 }
 0x1e4   : > { %v1042_v61 = vpack.c.bf16 %v1024_v59, %v1022_v58  ;;  %v988_v62 = vpop.f32.mrb[28].mxu0 }
 0x1e5   : > { %v989_v63 = vadd.f32 %v988_v62, %v2559_v26  ;;  %v990_v1 = vpop.f32.mrb[29].mxu0 }
 0x1e6   : > { %v991_v2 = vadd.f32 %v990_v1, %v2563_v27  ;;  %v992_v3 = vpop.f32.mrb[30].mxu0  ;;  %1341 = vmatprep.mubr.bf16.mxu1 %v1042_v61 }
 0x1e7   : > { %v993_v4 = vadd.f32 %v992_v3, %v2559_v26  ;;  %v994_v5 = vpop.f32.mrb[31].mxu0  ;;  %1342 = vmatmul.mubr.bf16.gmra.mrb[24].mxu1 %v1041_v60  ;;  %v1025_v7 = vmax.f32 %v989_v63, 0.0  ;;  %v2603_v26 = vrot.slane %v1077_v15, %v716_v23 }
 0x1e8   : > { %v995_v6 = vadd.f32 %v994_v5, %v2563_v27  ;;  %v1026_v10 = vmax.f32 %v991_v2, 0.0  ;;  %v2607_v27 = vrot.slane %v1077_v15, %v720_v25 }
 0x1e9   : > { %v1027_v8 = vmax.f32 %v993_v4, 0.0 }
 0x1ea   : > { %v1028_v11 = vmax.f32 %v995_v6, 0.0 }
 0x1eb   : > { %v1043_v12 = vpack.c.bf16 %v1027_v8, %v1025_v7 }
 0x1ec   : > { %v1044_v14 = vpack.c.bf16 %v1028_v11, %v1026_v10 }
 0x1ee   : > { %1351 = vmatprep.mubr.bf16.mxu1 %v1044_v14 }
 0x1ef   : > { %1352 = vmatmul.mubr.bf16.gmra.mrb[28].mxu1 %v1043_v12 }
 0x28a   : > { %v1283_v17 = vpop.f32.mrb[0].mxu1 }
 0x28b   : > { %v1284_v18 = vadd.f32 %v1283_v17, %v2603_v26  ;;  %v1285_v19 = vpop.f32.mrb[1].mxu1 }
 0x28c   : > { %v1286_v20 = vadd.f32 %v1285_v19, %v2607_v27  ;;  %v1287_v24 = vpop.f32.mrb[2].mxu1 }
 0x28d   : > { %1362 = vst [vmem:[%s2611_s4] sm:$0xff] %v1284_v18  ;;  %v1288_v21 = vadd.f32 %v1287_v24, %v2603_v26  ;;  %v1289_v23 = vpop.f32.mrb[3].mxu1 }
 0x28e   : > { %1363 = vst [vmem:[%s2611_s4 + $0x8] sm:$0xff] %v1286_v20  ;;  %v1290_v25 = vadd.f32 %v1289_v23, %v2607_v27 }
 0x28f   : > { %1364 = vst [vmem:[%s2611_s4 + $0x10] sm:$0xff] %v1288_v21 }
 0x290   : > { %1365 = vst [vmem:[%s2611_s4 + $0x18] sm:$0xff] %v1290_v25 }
 0x292   : > { %v1293_v28 = vpop.f32.mrb[4].mxu1 }
 0x293   : > { %v1294_v0 = vadd.f32 %v1293_v28, %v2603_v26  ;;  %v1295_v29 = vpop.f32.mrb[5].mxu1 }
 0x294   : > { %v1296_v30 = vadd.f32 %v1295_v29, %v2607_v27  ;;  %v1297_v31 = vpop.f32.mrb[6].mxu1 }
 0x295   : > { %1366 = vst [vmem:[%s2611_s4 + $0x20] sm:$0xff] %v1294_v0  ;;  %v1298_v32 = vadd.f32 %v1297_v31, %v2603_v26  ;;  %v1299_v33 = vpop.f32.mrb[7].mxu1 }
 0x296   : > { %1367 = vst [vmem:[%s2611_s4 + $0x28] sm:$0xff] %v1296_v30  ;;  %v1300_v34 = vadd.f32 %v1299_v33, %v2607_v27 }
 0x297   : > { %1368 = vst [vmem:[%s2611_s4 + $0x30] sm:$0xff] %v1298_v32 }
 0x298   : > { %1369 = vst [vmem:[%s2611_s4 + $0x38] sm:$0xff] %v1300_v34 }
 0x29a   : > { %v1303_v35 = vpop.f32.mrb[8].mxu1 }
 0x29b   : > { %v1304_v36 = vadd.f32 %v1303_v35, %v2603_v26  ;;  %v1305_v37 = vpop.f32.mrb[9].mxu1 }
 0x29c   : > { %v1306_v38 = vadd.f32 %v1305_v37, %v2607_v27  ;;  %v1307_v13 = vpop.f32.mrb[10].mxu1 }
 0x29d   : > { %1370 = vst [vmem:[%s2611_s4 + $0x40] sm:$0xff] %v1304_v36  ;;  %v1308_v9 = vadd.f32 %v1307_v13, %v2603_v26  ;;  %v1309_v16 = vpop.f32.mrb[11].mxu1 }
 0x29e   : > { %1371 = vst [vmem:[%s2611_s4 + $0x48] sm:$0xff] %v1306_v38  ;;  %v1310_v22 = vadd.f32 %v1309_v16, %v2607_v27 }
 0x29f   : > { %1372 = vst [vmem:[%s2611_s4 + $0x50] sm:$0xff] %v1308_v9 }
 0x2a0   : > { %1373 = vst [vmem:[%s2611_s4 + $0x58] sm:$0xff] %v1310_v22 }
 0x2a2   : > { %v1313_v41 = vpop.f32.mrb[12].mxu1 }
 0x2a3   : > { %v1314_v42 = vadd.f32 %v1313_v41, %v2603_v26  ;;  %v1315_v43 = vpop.f32.mrb[13].mxu1 }
 0x2a4   : > { %v1316_v44 = vadd.f32 %v1315_v43, %v2607_v27  ;;  %v1317_v39 = vpop.f32.mrb[14].mxu1 }
 0x2a5   : > { %1374 = vst [vmem:[%s2611_s4 + $0x60] sm:$0xff] %v1314_v42  ;;  %v1318_v40 = vadd.f32 %v1317_v39, %v2603_v26  ;;  %v1319_v45 = vpop.f32.mrb[15].mxu1 }
 0x2a6   : > { %1375 = vst [vmem:[%s2611_s4 + $0x68] sm:$0xff] %v1316_v44  ;;  %v1320_v46 = vadd.f32 %v1319_v45, %v2607_v27 }
 0x2a7   : > { %1376 = vst [vmem:[%s2611_s4 + $0x70] sm:$0xff] %v1318_v40 }
 0x2a8   : > { %1377 = vst [vmem:[%s2611_s4 + $0x78] sm:$0xff] %v1320_v46 }
 0x2aa   : > { %v1323_v48 = vpop.f32.mrb[16].mxu1 }
 0x2ab   : > { %v1324_v47 = vadd.f32 %v1323_v48, %v2603_v26  ;;  %v1325_v49 = vpop.f32.mrb[17].mxu1 }
 0x2ac   : > { %v1326_v50 = vadd.f32 %v1325_v49, %v2607_v27  ;;  %v1327_v51 = vpop.f32.mrb[18].mxu1 }
 0x2ad   : > { %1378 = vst [vmem:[%s2611_s4 + $0x80] sm:$0xff] %v1324_v47  ;;  %v1328_v52 = vadd.f32 %v1327_v51, %v2603_v26  ;;  %v1329_v53 = vpop.f32.mrb[19].mxu1 }
 0x2ae   : > { %1379 = vst [vmem:[%s2611_s4 + $0x88] sm:$0xff] %v1326_v50  ;;  %v1330_v54 = vadd.f32 %v1329_v53, %v2607_v27 }
 0x2af   : > { %1380 = vst [vmem:[%s2611_s4 + $0x90] sm:$0xff] %v1328_v52 }
 0x2b0   : > { %1381 = vst [vmem:[%s2611_s4 + $0x98] sm:$0xff] %v1330_v54 }
 0x2b2   : > { %v1333_v55 = vpop.f32.mrb[20].mxu1 }
 0x2b3   : > { %v1334_v56 = vadd.f32 %v1333_v55, %v2603_v26  ;;  %v1335_v57 = vpop.f32.mrb[21].mxu1 }
 0x2b4   : > { %v1336_v58 = vadd.f32 %v1335_v57, %v2607_v27  ;;  %v1337_v59 = vpop.f32.mrb[22].mxu1 }
 0x2b5   : > { %1382 = vst [vmem:[%s2611_s4 + $0xa0] sm:$0xff] %v1334_v56  ;;  %v1338_v60 = vadd.f32 %v1337_v59, %v2603_v26  ;;  %v1339_v61 = vpop.f32.mrb[23].mxu1 }
 0x2b6   : > { %1383 = vst [vmem:[%s2611_s4 + $0xa8] sm:$0xff] %v1336_v58  ;;  %v1340_v62 = vadd.f32 %v1339_v61, %v2607_v27 }
 0x2b7   : > { %1384 = vst [vmem:[%s2611_s4 + $0xb0] sm:$0xff] %v1338_v60 }
 0x2b8   : > { %1385 = vst [vmem:[%s2611_s4 + $0xb8] sm:$0xff] %v1340_v62 }
 0x2ba   : > { %v1343_v63 = vpop.f32.mrb[24].mxu1 }
 0x2bb   : > { %v1344_v1 = vadd.f32 %v1343_v63, %v2603_v26  ;;  %v1345_v2 = vpop.f32.mrb[25].mxu1 }
 0x2bc   : > { %v1346_v3 = vadd.f32 %v1345_v2, %v2607_v27  ;;  %v1347_v4 = vpop.f32.mrb[26].mxu1 }
 0x2bd   : > { %1386 = vst [vmem:[%s2611_s4 + $0xc0] sm:$0xff] %v1344_v1  ;;  %v1348_v5 = vadd.f32 %v1347_v4, %v2603_v26  ;;  %v1349_v6 = vpop.f32.mrb[27].mxu1 }
 0x2be   : > { %1387 = vst [vmem:[%s2611_s4 + $0xc8] sm:$0xff] %v1346_v3  ;;  %v1350_v7 = vadd.f32 %v1349_v6, %v2607_v27 }
 0x2bf   : > { %1388 = vst [vmem:[%s2611_s4 + $0xd0] sm:$0xff] %v1348_v5 }
 0x2c0   : > { %1389 = vst [vmem:[%s2611_s4 + $0xd8] sm:$0xff] %v1350_v7 }
 0x2c2   : > { %v1353_v8 = vpop.f32.mrb[28].mxu1 }
 0x2c3   : > { %v1354_v10 = vadd.f32 %v1353_v8, %v2603_v26  ;;  %v1355_v11 = vpop.f32.mrb[29].mxu1 }
 0x2c4   : > { %v1356_v12 = vadd.f32 %v1355_v11, %v2607_v27  ;;  %v1357_v14 = vpop.f32.mrb[30].mxu1 }
 0x2c5   : > { %1390 = vst [vmem:[%s2611_s4 + $0xe0] sm:$0xff] %v1354_v10  ;;  %v1358_v15 = vadd.f32 %v1357_v14, %v2603_v26  ;;  %v1359_v17 = vpop.f32.mrb[31].mxu1 }
 0x2c6   : > { %1391 = vst [vmem:[%s2611_s4 + $0xe8] sm:$0xff] %v1356_v12  ;;  %v1360_v18 = vadd.f32 %v1359_v17, %v2607_v27 }
 0x2c7   : > { %1392 = vst [vmem:[%s2611_s4 + $0xf0] sm:$0xff] %v1358_v15 }
 0x2c8   : > { %1393 = vst [vmem:[%s2611_s4 + $0xf8] sm:$0xff] %v1360_v18 }
 0x2c9   : > { %2080 = shalt.err (!%p2077_p7)
}
 0x2ca   : > { %s2081_s29 = scalar_lea.hbm %s2676_s0, 4096  ;;  %s2085_s14 = scalar_lea.hbm %s2732_s6, 8192 }
 0x2cb   : > { %p2082_p9 = scmp.ne.s32.totalorder %s2676_s0, %s2081_s29  ;;  %p2086_p11 = scmp.lt.u32.totalorder %s2676_s0, %s2732_s6 }
 0x2cc   : > { %p2087_p2 = scmp.lt.u32.totalorder %s2085_s14, %s2081_s29  ;;  %p2089_p1 = scmp.lt.u32.totalorder %s2081_s29, %s2676_s0 }
 0x2cd   : > { %p2083_p0 = pnand %p2082_p9, %p2760_p13 }
 0x2ce   : > { %p2088_p12 = por %p2087_p2, %p2086_p11 }
 0x2cf   : > { %p2084_p8 = pneg %p2083_p0 }
 0x2d0   : > { %p2090_p6 = por %p2089_p1, %p2088_p12 }
 0x2d2   : > { %p2091_p10 = pnand %p2090_p6, %p2084_p8 }
 0x2d4   : > { %2094 = shalt.err (!%p2091_p10)
}
 0x2d5   : > { %s2154_s30 = smov 256   ;;  %s2155_s4 = smov 16  }
 0x2d6   : > { %1663 = dma.vmem_to_hbm [thread:$0]  (%p2760_p13), %s2678_s20, 4096, %s2676_s0, %s1395_s25, %s2154_s30, %s2154_s30, %s2155_s4  }
 0x2d7 PF: > { %s1424_s13 = sand.u32 1, %s2133_s21   ;;  %p2761_p4 = scmp.ne.s32.totalorder %s2744_s28, 0 }
 0x2d8   : > { %p2762_p5 = scmp.ge.s32.totalorder %s2145_s24, 2  ;;  %s1425_s16 = scalar_lea.sflag [#allocation4], %s1424_s13 }
 0x2da   : > { %p1680_p3 = pnand %p2762_p5, %p2761_p4 }
 0x2dc   : > { %2128 = dma.done.wait (!%p1680_p3), %s1425_s16, 4096  }
 0x2dd   : > { %2130 = vsyncadd (!%p1680_p3), %s1425_s16, 4294963200  ;;  %p23_p7 = scmp.ge.s32.totalorder %s2307_s8, 4   ;;  %s2763_s21 = smov %s2137_s22 }
 0x2de   : > { %s2764_s22 = smov %s2141_s23  ;;  %s2765_s23 = smov %s2323_s11 }
 0x2df   : > { %s2766_s24 = smov %s2307_s8  ;;  %25 = sbr.rel (!%p23_p7) target bundleno = 12 (0xc), region = 110 }
 0x2e6   :  { %1430 = vsyncpa [#allocation3], 1 }
 0x2e7   :  { %1432 = vsyncpa [#allocation3 + $0x1], 1 }
 0x2e8   :  { %1433 = vsyncpa [#allocation6], 1 }
 0x2e9   :  { %1435 = vsyncpa [#allocation6 + $0x1], 1 }
 0x2ea   :  { %1436 = vsyncpa [#allocation9], 1 }
 0x2eb   :  { %1437 = vsyncpa [#allocation4], 1 }
 0x2ec   :  { %1439 = vsyncpa [#allocation4 + $0x1], 1 }

</bundles_post_ra>
